<compile_context>
chip_gen: v5e
topology: v5e:2x2
jax: 0.10.0
libtpu: 0.0.40
codegen_flags: <defaults>
</compile_context>

<pallas_src>
import functools

import jax
import jax.numpy as jnp
from jax import lax
from jax.experimental import pallas as pl
from jax.experimental.pallas import tpu as pltpu
import numpy as np


def _repvgg_kernel(x_ref, w_ref, b_ref, o_ref, xpad_ref, *,
                   H, W, Cin, Hblk, fold_k):
    """Grid: (batch, cout_tile, row_tile).

    x_ref   : (1, H, W, Cin)      bf16 NHWC activation (full image per batch)
    w_ref   : (Cblk, 9*Cin)       bf16 re-parameterized weights, K = (dy,dx,ci)
    b_ref   : (Cblk, 1)           f32 total fused bias
    o_ref   : (1, Cblk, Hblk*W)   NCHW-layout output tile (lane-dense)
    xpad_ref: (H+2, W+2, Cin)     bf16 zero-padded image scratch
    """
    r = pl.program_id(2)

    # Build the zero-padded image once per (batch, cout-tile); the input
    # block index is constant across (co, r), so Pallas DMAs the image only
    # once per batch element.  Only the 1-pixel border is zeroed.
    @pl.when(r == 0)
    def _():
        zrow = jnp.zeros((1, W + 2, Cin), xpad_ref.dtype)
        xpad_ref[0:1] = zrow
        xpad_ref[H + 1:H + 2] = zrow
        zcol = jnp.zeros((H, 1, Cin), xpad_ref.dtype)
        xpad_ref[1:1 + H, 0:1, :] = zcol
        xpad_ref[1:1 + H, W + 1:W + 2, :] = zcol
        xpad_ref[1:1 + H, 1:1 + W, :] = x_ref[0]

    row0 = r * Hblk
    taps = [(dy, dx) for dy in range(3) for dx in range(3)]

    if fold_k:
        # Small Cin: fold the 9 taps into the contraction dim (K = 9*Cin).
        cols = [
            xpad_ref[pl.ds(row0 + dy, Hblk), dx:dx + W, :].reshape(Hblk * W, Cin)
            for dy, dx in taps
        ]
        patch = jnp.concatenate(cols, axis=-1)              # (Hblk*W, 9*Cin) bf16
        # (Cblk, 9*Cin) x (Hblk*W, 9*Cin)^T -> (Cblk, Hblk*W); f32 accumulate.
        out_t = jnp.einsum("ok,rk->or", w_ref[...], patch,
                           preferred_element_type=jnp.float32)
    else:
        # Large Cin: no im2col concat buffer; 9 accumulating matmuls.
        out_t = jnp.zeros(o_ref.shape[1:], jnp.float32)
        for t, (dy, dx) in enumerate(taps):
            piece = xpad_ref[pl.ds(row0 + dy, Hblk), dx:dx + W, :] \
                .reshape(Hblk * W, Cin)
            out_t = out_t + jnp.einsum(
                "ok,rk->or", w_ref[:, t * Cin:(t + 1) * Cin], piece,
                preferred_element_type=jnp.float32)

    o_ref[0] = jnp.maximum(out_t + b_ref[...], 0.0).astype(o_ref.dtype)


def _param_spec(block_shape, index_map):
    """Single-buffered BlockSpec for weights/bias (block index ~constant)."""
    try:
        return pl.BlockSpec(block_shape, index_map,
                            pipeline_mode=pl.Buffered(1))
    except TypeError:
        # TODO(synk): pipeline_mode unsupported in this jax version; fall
        #             back to the default double-buffered spec.
        return pl.BlockSpec(block_shape, index_map)


def _estimate_vmem(Hblk, *, H, W, Cin, cout_blk, fold_k, out_itemsize,
                   w_buffers=1):
    img = 2 * H * W * Cin * 2                        # double-buffered bf16 image
    xpad = (H + 2) * (W + 2) * Cin * 2               # bf16 padded scratch
    wts = w_buffers * cout_blk * 9 * Cin * 2         # bf16 weights
    bias = w_buffers * cout_blk * 4
    outb = 2 * cout_blk * Hblk * W * out_itemsize    # double-buffered out tile
    patch = Hblk * W * 9 * Cin * 2 if fold_k else 0  # im2col buffer (small Cin)
    acc = cout_blk * Hblk * W * 4                    # f32 result before store
    return img + xpad + wts + bias + outb + patch + acc


def _pick_row_block(H, W, Cin, cout_blk, fold_k, out_itemsize, budget):
    """Largest row block that divides H and fits the VMEM budget, preferring
    lane-aligned output tiles (Hblk*W % 128 == 0)."""
    divs = [hb for hb in range(1, H + 1) if H % hb == 0]
    fits = [hb for hb in divs
            if _estimate_vmem(hb, H=H, W=W, Cin=Cin, cout_blk=cout_blk,
                              fold_k=fold_k, out_itemsize=out_itemsize)
            <= budget]
    aligned = [hb for hb in fits if (hb * W) % 128 == 0]
    if aligned:
        return max(aligned)
    if fits:
        return max(fits)   # masked partial stores, but stays within budget
    return 1


def _pick_cout_block(Cout, max_block=256):
    best = 1
    for cb in range(1, Cout + 1):
        if Cout % cb == 0 and cb <= max_block:
            best = cb
    return best


def repvgg_block_forward_nhwc(x_nhwc, params, *, row_block=None,
                              cout_block=None, out_dtype=jnp.float32):
    """x_nhwc: (N, H, W, Cin) (any float dtype; cast to bf16 inside).
    Returns (N, Cout, H, W) in out_dtype."""
    N, H, W, Cin = x_nhwc.shape
    w_t = params["w_t"]            # (Cout, 9*Cin) bf16
    bias = params["bias"]          # (Cout, 1)     f32
    Cout = w_t.shape[0]
    fold_k = Cin < 128
    out_itemsize = jnp.dtype(out_dtype).itemsize

    # Generation-aware VMEM budgets (v7x: 64 MiB/TC; v5e/v6e: 128 MiB).
    try:
        vmem_phys = int(pltpu.get_tpu_info().vmem_capacity_bytes)
    except Exception:
        vmem_phys = 128 * 1024 * 1024
    if vmem_phys <= 64 * 1024 * 1024:
        vmem_limit = max(vmem_phys - 12 * 1024 * 1024, 32 * 1024 * 1024)
        tile_budget = 20 * 1024 * 1024
    else:
        vmem_limit = 96 * 1024 * 1024
        tile_budget = 48 * 1024 * 1024

    if cout_block is None or Cout % cout_block != 0:
        cout_block = _pick_cout_block(Cout)
    if row_block is None or H % row_block != 0:
        row_block = _pick_row_block(H, W, Cin, cout_block, fold_k,
                                    out_itemsize, tile_budget)
    n_co = Cout // cout_block
    n_rt = H // row_block

    x_bf16 = x_nhwc.astype(jnp.bfloat16)

    kernel = functools.partial(_repvgg_kernel, H=H, W=W, Cin=Cin,
                               Hblk=row_block, fold_k=fold_k)

    cost = pl.CostEstimate(
        flops=2 * N * Cout * 9 * Cin * H * W,
        transcendentals=0,
        bytes_accessed=(N * H * W * Cin * 2 + Cout * 9 * Cin * 2 + Cout * 4
                        + N * Cout * H * W * out_itemsize))

    out = pl.pallas_call(
        kernel,
        out_shape=jax.ShapeDtypeStruct((N, Cout, H * W), out_dtype),
        grid_spec=pltpu.PrefetchScalarGridSpec(
            num_scalar_prefetch=0,
            grid=(N, n_co, n_rt),
            in_specs=[
                # full image per batch element; block index constant in
                # (co, r) so it is fetched once per n and reused
                pl.BlockSpec((1, H, W, Cin), lambda n, co, r: (n, 0, 0, 0)),
                # weights / bias change only with the (rare) Cout tile index;
                # single-buffered to halve their VMEM footprint
                _param_spec((cout_block, 9 * Cin), lambda n, co, r: (co, 0)),
                _param_spec((cout_block, 1), lambda n, co, r: (co, 0)),
            ],
            out_specs=pl.BlockSpec((1, cout_block, row_block * W),
                                   lambda n, co, r: (n, co, r)),
            scratch_shapes=[pltpu.VMEM((H + 2, W + 2, Cin), jnp.bfloat16)],
        ),
        compiler_params=pltpu.CompilerParams(
            dimension_semantics=("parallel", "parallel", "arbitrary"),
            vmem_limit_bytes=int(vmem_limit)),
        cost_estimate=cost,
    )(x_bf16, w_t, bias)

    # (N, Cout, H*W) -> (N, Cout, H, W): free reshape, already NCHW order.
    return out.reshape(N, Cout, H, W)


def repvgg_block_forward(x_nchw, params, *, row_block=None, cout_block=None,
                         out_dtype=jnp.float32):
    """x_nchw: (N, Cin, H, W) float32. Returns (N, Cout, H, W) in out_dtype."""
    # NCHW -> NHWC fused with the bf16 cast (one XLA pass); no jnp.pad.
    x_nhwc = jnp.transpose(x_nchw, (0, 2, 3, 1)).astype(jnp.bfloat16)
    return repvgg_block_forward_nhwc(x_nhwc, params, row_block=row_block,
                                     cout_block=cout_block,
                                     out_dtype=out_dtype)


def make_params(key, in_channels, out_channels, eps=1e-5):
    """Deterministic parameters mirroring the module's shapes, with eval-mode
    BatchNorm folded per branch and the three branches re-parameterized into
    a single 3x3 kernel + bias (RepVGG structural re-param)."""
    ks = jax.random.split(key, 16)
    f32 = jnp.float32
    Cin, Cout = in_channels, out_channels

    # rbr_dense: Conv2d(3x3, bias=True) + BatchNorm2d
    w3 = jax.random.normal(ks[0], (Cout, Cin, 3, 3), f32) * 0.1
    b3 = jax.random.normal(ks[1], (Cout,), f32) * 0.05
    g3 = jax.random.uniform(ks[2], (Cout,), f32, 0.5, 1.5)
    be3 = jax.random.normal(ks[3], (Cout,), f32) * 0.1
    m3 = jax.random.normal(ks[4], (Cout,), f32) * 0.1
    v3 = jax.random.uniform(ks[5], (Cout,), f32, 0.5, 1.5)

    # rbr_1x1: Conv2d(1x1, bias=True) + BatchNorm2d
    w1 = jax.random.normal(ks[6], (Cout, Cin, 1, 1), f32) * 0.1
    b1 = jax.random.normal(ks[7], (Cout,), f32) * 0.05
    g1 = jax.random.uniform(ks[8], (Cout,), f32, 0.5, 1.5)
    be1 = jax.random.normal(ks[9], (Cout,), f32) * 0.1
    m1 = jax.random.normal(ks[10], (Cout,), f32) * 0.1
    v1 = jax.random.uniform(ks[11], (Cout,), f32, 0.5, 1.5)

    # rbr_identity: BatchNorm2d(Cin) (exists only if Cin == Cout, stride == 1)
    gi = jax.random.uniform(ks[12], (Cin,), f32, 0.5, 1.5)
    bei = jax.random.normal(ks[13], (Cin,), f32) * 0.1
    mi = jax.random.normal(ks[14], (Cin,), f32) * 0.1
    vi = jax.random.uniform(ks[15], (Cin,), f32, 0.5, 1.5)

    has_identity = (Cin == Cout)

    t3 = g3 / jnp.sqrt(v3 + eps)
    t1 = g1 / jnp.sqrt(v1 + eps)

    k3 = w3 * t3[:, None, None, None]                            # (O,I,3,3)
    k1 = jnp.zeros((Cout, Cin, 3, 3), f32)
    k1 = k1.at[:, :, 1, 1].set(w1[:, :, 0, 0] * t1[:, None])     # pad 1x1->3x3
    bias3 = be3 + (b3 - m3) * t3
    bias1 = be1 + (b1 - m1) * t1

    if has_identity:
        ti = gi / jnp.sqrt(vi + eps)
        kid = jnp.zeros((Cout, Cin, 3, 3), f32)
        kid = kid.at[jnp.arange(Cin), jnp.arange(Cin), 1, 1].set(ti)
        biasid = bei - mi * ti
    else:
        kid = jnp.zeros((Cout, Cin, 3, 3), f32)
        biasid = jnp.zeros((Cout,), f32)

    k_eq = k3 + k1 + kid                    # OIHW equivalent 3x3 kernel
    bias_eq = bias3 + bias1 + biasid        # (Cout,)

    # Kernel-side layouts: weights (Cout, 9*Cin) bf16 with K ordered
    # (dy, dx, ci) to match the in-kernel im2col; bias (Cout, 1) f32.
    w_t = jnp.transpose(k_eq, (0, 2, 3, 1)).reshape(Cout, 9 * Cin)
    params = {
        "w_t": w_t.astype(jnp.bfloat16),
        "bias": bias_eq[:, None].astype(f32),
        "k_eq": k_eq,          # f32, for the fused reference
        "bias_eq": bias_eq,    # f32, for the fused reference
    }
    raw = dict(w3=w3, b3=b3, g3=g3, be3=be3, m3=m3, v3=v3,
               w1=w1, b1=b1, g1=g1, be1=be1, m1=m1, v1=v1,
               gi=gi, bei=bei, mi=mi, vi=vi, eps=eps)
    return params, raw, has_identity


def reference_forward(x, raw, has_identity):
    """Pure-JAX f32 reference matching the PyTorch forward (eval-mode BN)."""
    def conv(x, w, b, pad):
        y = lax.conv_general_dilated(
            x, w, window_strides=(1, 1), padding=[(pad, pad), (pad, pad)],
            dimension_numbers=("NCHW", "OIHW", "NCHW"))
        return y + b[None, :, None, None]

    def bn(y, g, b, m, v, eps):
        inv = g / jnp.sqrt(v + eps)
        return (y - m[None, :, None, None]) * inv[None, :, None, None] \
            + b[None, :, None, None]

    eps = raw["eps"]
    dense = bn(conv(x, raw["w3"], raw["b3"], 1),
               raw["g3"], raw["be3"], raw["m3"], raw["v3"], eps)
    one = bn(conv(x, raw["w1"], raw["b1"], 0),
             raw["g1"], raw["be1"], raw["m1"], raw["v1"], eps)
    ident = bn(x, raw["gi"], raw["bei"], raw["mi"], raw["vi"], eps) \
        if has_identity else 0.0
    return jax.nn.relu(dense + one + ident)


def fused_reference_bf16(x, k_eq, bias_eq):
    """Re-parameterized single-conv reference with the same bf16 quantization
    of inputs/weights the kernel uses (isolates kernel math from rounding)."""
    xb = x.astype(jnp.bfloat16).astype(jnp.float32)
    kb = k_eq.astype(jnp.bfloat16).astype(jnp.float32)
    y = lax.conv_general_dilated(
        xb, kb, window_strides=(1, 1), padding=[(1, 1), (1, 1)],
        dimension_numbers=("NCHW", "OIHW", "NCHW"))
    return jax.nn.relu(y + bias_eq[None, :, None, None])


if __name__ == "__main__":
    key = jax.random.PRNGKey(0)
    k_x, k_p = jax.random.split(key)

    # in_channels == out_channels, kernel_size=3, stride=1, padding=1
    N, C, H, W = 2, 4, 16, 16
    x = jax.random.normal(k_x, (N, C, H, W), jnp.float32)

    params, raw, has_identity = make_params(k_p, in_channels=C, out_channels=C)

    # row_block=8 -> grid (2 batches, 1 cout tile, 2 row tiles): exercises the
    # spatial tiling path with a lane-aligned (8*16=128) output tile.
    out = repvgg_block_forward(x, params, row_block=8)
    out = jax.block_until_ready(out)

    # Kernel-math check against an identically bf16-quantized fused conv.
    ref_fused = fused_reference_bf16(x, params["k_eq"], params["bias_eq"])
    np.testing.assert_allclose(np.asarray(out), np.asarray(ref_fused),
                               rtol=2e-3, atol=2e-3)

    # Semantic check against the module's f32 three-branch forward
    # (tolerance accounts for bf16 activation/weight quantization).
    ref = reference_forward(x, raw, has_identity)
    np.testing.assert_allclose(np.asarray(out), np.asarray(ref),
                               rtol=5e-2, atol=5e-2)

    print("KERNEL_OK")
</pallas_src>

<mosaic_0001>
module attributes {stable_mosaic.version = 11 : i64} {
  func.func @_repvgg_kernel(%arg0: i32, %arg1: i32, %arg2: i32, %arg3: memref<1x16x16x4xbf16, #tpu.memory_space<vmem>>, %arg4: memref<4x36xbf16, #tpu.memory_space<vmem>>, %arg5: memref<4x1xf32, #tpu.memory_space<vmem>>, %arg6: memref<1x4x128xf32, #tpu.memory_space<vmem>>, %arg7: memref<18x18x4xbf16, #tpu.memory_space<vmem>>) attributes {dimension_semantics = [#tpu.dimension_semantics<parallel>, #tpu.dimension_semantics<parallel>, #tpu.dimension_semantics<arbitrary>], iteration_bounds = array<i64: 2, 1, 2>, scalar_prefetch = 0 : i64, scratch_operands = 1 : i64, tpu.core_type = #tpu.core_type<tc>, window_params = [{transform_indices = @transform_0, window_bounds = array<i64: 1, 16, 16, 4>}, {pipeline_mode = #tpu.pipeline_mode<synchronous>, transform_indices = @transform_1, window_bounds = array<i64: 4, 36>}, {pipeline_mode = #tpu.pipeline_mode<synchronous>, transform_indices = @transform_2, window_bounds = array<i64: 4, 1>}, {transform_indices = @transform_3, window_bounds = array<i64: 1, 4, 128>}]} {
    %c0_i32 = arith.constant 0 : i32
    %0 = arith.cmpi eq, %arg2, %c0_i32 : i32
    %1 = arith.extui %0 : i1 to i32
    %c0_i32_0 = arith.constant 0 : i32
    %2 = arith.cmpi ne, %1, %c0_i32_0 : i32
    scf.if %2 {
      %cst_31 = arith.constant 0.000000e+00 : bf16
      %51 = vector.broadcast %cst_31 : bf16 to vector<1x18x4xbf16>
      %c0_32 = arith.constant 0 : index
      %c0_33 = arith.constant 0 : index
      %c0_34 = arith.constant 0 : index
      %52 = vector.load %arg7[%c0_32, %c0_33, %c0_34] : memref<18x18x4xbf16, #tpu.memory_space<vmem>>, vector<1x18x4xbf16>
      tpu.vector_store %arg7[%c0_32, %c0_33, %c0_34], %51 {strides = array<i32>} : memref<18x18x4xbf16, #tpu.memory_space<vmem>>, vector<1x18x4xbf16>,
      %c17 = arith.constant 17 : index
      %c0_35 = arith.constant 0 : index
      %c0_36 = arith.constant 0 : index
      %53 = vector.load %arg7[%c17, %c0_35, %c0_36] : memref<18x18x4xbf16, #tpu.memory_space<vmem>>, vector<1x18x4xbf16>
      tpu.vector_store %arg7[%c17, %c0_35, %c0_36], %51 {strides = array<i32>} : memref<18x18x4xbf16, #tpu.memory_space<vmem>>, vector<1x18x4xbf16>,
      %cst_37 = arith.constant 0.000000e+00 : bf16
      %54 = vector.broadcast %cst_37 : bf16 to vector<16x1x4xbf16>
      %c1_38 = arith.constant 1 : index
      %c0_39 = arith.constant 0 : index
      %c0_40 = arith.constant 0 : index
      %55 = vector.load %arg7[%c1_38, %c0_39, %c0_40] : memref<18x18x4xbf16, #tpu.memory_space<vmem>>, vector<16x1x4xbf16>
      tpu.vector_store %arg7[%c1_38, %c0_39, %c0_40], %54 {strides = array<i32>} : memref<18x18x4xbf16, #tpu.memory_space<vmem>>, vector<16x1x4xbf16>,
      %c1_41 = arith.constant 1 : index
      %c17_42 = arith.constant 17 : index
      %c0_43 = arith.constant 0 : index
      %56 = vector.load %arg7[%c1_41, %c17_42, %c0_43] : memref<18x18x4xbf16, #tpu.memory_space<vmem>>, vector<16x1x4xbf16>
      tpu.vector_store %arg7[%c1_41, %c17_42, %c0_43], %54 {strides = array<i32>} : memref<18x18x4xbf16, #tpu.memory_space<vmem>>, vector<16x1x4xbf16>,
      %c0_44 = arith.constant 0 : index
      %c0_45 = arith.constant 0 : index
      %c0_46 = arith.constant 0 : index
      %c0_47 = arith.constant 0 : index
      %57 = vector.load %arg3[%c0_44, %c0_45, %c0_46, %c0_47] : memref<1x16x16x4xbf16, #tpu.memory_space<vmem>>, vector<1x16x16x4xbf16>
      %58 = vector.shape_cast %57 : vector<1x16x16x4xbf16> to vector<16x16x4xbf16>
      %c1_48 = arith.constant 1 : index
      %c1_49 = arith.constant 1 : index
      %c0_50 = arith.constant 0 : index
      %59 = vector.load %arg7[%c1_48, %c1_49, %c0_50] : memref<18x18x4xbf16, #tpu.memory_space<vmem>>, vector<16x16x4xbf16>
      tpu.vector_store %arg7[%c1_48, %c1_49, %c0_50], %58 {strides = array<i32>} : memref<18x18x4xbf16, #tpu.memory_space<vmem>>, vector<16x16x4xbf16>,
    } else {
    }
    %c8_i32 = arith.constant 8 : i32
    %3 = arith.muli %arg2, %c8_i32 : i32
    %c0_i32_1 = arith.constant 0 : i32
    %4 = arith.addi %3, %c0_i32_1 : i32
    %5 = arith.index_cast %4 : i32 to index
    %c0 = arith.constant 0 : index
    %c0_2 = arith.constant 0 : index
    %6 = vector.load %arg7[%5, %c0, %c0_2] : memref<18x18x4xbf16, #tpu.memory_space<vmem>>, vector<8x16x4xbf16>
    %7 = vector.shape_cast %6 : vector<8x16x4xbf16> to vector<128x4xbf16>
    %c0_i32_3 = arith.constant 0 : i32
    %8 = arith.addi %3, %c0_i32_3 : i32
    %9 = arith.index_cast %8 : i32 to index
    %c1 = arith.constant 1 : index
    %c0_4 = arith.constant 0 : index
    %10 = vector.load %arg7[%9, %c1, %c0_4] : memref<18x18x4xbf16, #tpu.memory_space<vmem>>, vector<8x16x4xbf16>
    %11 = vector.shape_cast %10 : vector<8x16x4xbf16> to vector<128x4xbf16>
    %c0_i32_5 = arith.constant 0 : i32
    %12 = arith.addi %3, %c0_i32_5 : i32
    %13 = arith.index_cast %12 : i32 to index
    %c2 = arith.constant 2 : index
    %c0_6 = arith.constant 0 : index
    %14 = vector.load %arg7[%13, %c2, %c0_6] : memref<18x18x4xbf16, #tpu.memory_space<vmem>>, vector<8x16x4xbf16>
    %15 = vector.shape_cast %14 : vector<8x16x4xbf16> to vector<128x4xbf16>
    %c1_i32 = arith.constant 1 : i32
    %16 = arith.addi %3, %c1_i32 : i32
    %17 = arith.index_cast %16 : i32 to index
    %c0_7 = arith.constant 0 : index
    %c0_8 = arith.constant 0 : index
    %18 = vector.load %arg7[%17, %c0_7, %c0_8] : memref<18x18x4xbf16, #tpu.memory_space<vmem>>, vector<8x16x4xbf16>
    %19 = vector.shape_cast %18 : vector<8x16x4xbf16> to vector<128x4xbf16>
    %c1_i32_9 = arith.constant 1 : i32
    %20 = arith.addi %3, %c1_i32_9 : i32
    %21 = arith.index_cast %20 : i32 to index
    %c1_10 = arith.constant 1 : index
    %c0_11 = arith.constant 0 : index
    %22 = vector.load %arg7[%21, %c1_10, %c0_11] : memref<18x18x4xbf16, #tpu.memory_space<vmem>>, vector<8x16x4xbf16>
    %23 = vector.shape_cast %22 : vector<8x16x4xbf16> to vector<128x4xbf16>
    %c1_i32_12 = arith.constant 1 : i32
    %24 = arith.addi %3, %c1_i32_12 : i32
    %25 = arith.index_cast %24 : i32 to index
    %c2_13 = arith.constant 2 : index
    %c0_14 = arith.constant 0 : index
    %26 = vector.load %arg7[%25, %c2_13, %c0_14] : memref<18x18x4xbf16, #tpu.memory_space<vmem>>, vector<8x16x4xbf16>
    %27 = vector.shape_cast %26 : vector<8x16x4xbf16> to vector<128x4xbf16>
    %c2_i32 = arith.constant 2 : i32
    %28 = arith.addi %3, %c2_i32 : i32
    %29 = arith.index_cast %28 : i32 to index
    %c0_15 = arith.constant 0 : index
    %c0_16 = arith.constant 0 : index
    %30 = vector.load %arg7[%29, %c0_15, %c0_16] : memref<18x18x4xbf16, #tpu.memory_space<vmem>>, vector<8x16x4xbf16>
    %31 = vector.shape_cast %30 : vector<8x16x4xbf16> to vector<128x4xbf16>
    %c2_i32_17 = arith.constant 2 : i32
    %32 = arith.addi %3, %c2_i32_17 : i32
    %33 = arith.index_cast %32 : i32 to index
    %c1_18 = arith.constant 1 : index
    %c0_19 = arith.constant 0 : index
    %34 = vector.load %arg7[%33, %c1_18, %c0_19] : memref<18x18x4xbf16, #tpu.memory_space<vmem>>, vector<8x16x4xbf16>
    %35 = vector.shape_cast %34 : vector<8x16x4xbf16> to vector<128x4xbf16>
    %c2_i32_20 = arith.constant 2 : i32
    %36 = arith.addi %3, %c2_i32_20 : i32
    %37 = arith.index_cast %36 : i32 to index
    %c2_21 = arith.constant 2 : index
    %c0_22 = arith.constant 0 : index
    %38 = vector.load %arg7[%37, %c2_21, %c0_22] : memref<18x18x4xbf16, #tpu.memory_space<vmem>>, vector<8x16x4xbf16>
    %39 = vector.shape_cast %38 : vector<8x16x4xbf16> to vector<128x4xbf16>
    %40 = tpu.concatenate %7, %11, %15, %19, %23, %27, %31, %35, %39 in 1 : vector<128x4xbf16>, vector<128x4xbf16>, vector<128x4xbf16>, vector<128x4xbf16>, vector<128x4xbf16>, vector<128x4xbf16>, vector<128x4xbf16>, vector<128x4xbf16>, vector<128x4xbf16> -> vector<128x36xbf16>
    %c0_23 = arith.constant 0 : index
    %c0_24 = arith.constant 0 : index
    %41 = vector.load %arg4[%c0_23, %c0_24] : memref<4x36xbf16, #tpu.memory_space<vmem>>, vector<4x36xbf16>
    "tpu.trace_start"() <{level = 10 : i32, message = "ok,rk->or"}> : () -> ()
    %cst = arith.constant dense<0.000000e+00> : vector<4x128xf32>
    %42 = tpu.matmul %41, %40, %cst {dimension_numbers = #tpu.dot_dimension_numbers<[1], [1], [0], [0], [0, 0, 1, 0], [], []>} : vector<4x36xbf16>, vector<128x36xbf16>, vector<4x128xf32> -> vector<4x128xf32>
    "tpu.trace_stop"() : () -> ()
    %c0_25 = arith.constant 0 : index
    %c0_26 = arith.constant 0 : index
    %43 = vector.load %arg5[%c0_25, %c0_26] : memref<4x1xf32, #tpu.memory_space<vmem>>, vector<4x1xf32>
    %44 = vector.broadcast %43 : vector<4x1xf32> to vector<4x128xf32>
    %45 = arith.addf %42, %44 : vector<4x128xf32>
    %cst_27 = arith.constant 0.000000e+00 : f32
    %46 = vector.broadcast %cst_27 : f32 to vector<4x128xf32>
    %47 = arith.maximumf %45, %46 : vector<4x128xf32>
    %c0_28 = arith.constant 0 : index
    %c0_29 = arith.constant 0 : index
    %c0_30 = arith.constant 0 : index
    %48 = vector.load %arg6[%c0_28, %c0_29, %c0_30] : memref<1x4x128xf32, #tpu.memory_space<vmem>>, vector<1x4x128xf32>
    %49 = vector.shape_cast %48 : vector<1x4x128xf32> to vector<4x128xf32>
    %50 = vector.shape_cast %47 : vector<4x128xf32> to vector<1x4x128xf32>
    tpu.vector_store %arg6[%c0_28, %c0_29, %c0_30], %50 {strides = array<i32>} : memref<1x4x128xf32, #tpu.memory_space<vmem>>, vector<1x4x128xf32>,
    return
  }
  func.func @transform_0(%arg0: i32, %arg1: i32, %arg2: i32) -> (i32, i32, i32, i32) {
    %c0_i32 = arith.constant 0 : i32
    %c0_i32_0 = arith.constant 0 : i32
    %c0_i32_1 = arith.constant 0 : i32
    %c0_i32_2 = arith.constant 0 : i32
    return %arg0, %c0_i32, %c0_i32_0, %c0_i32_1 : i32, i32, i32, i32
  }
  func.func @transform_1(%arg0: i32, %arg1: i32, %arg2: i32) -> (i32, i32) {
    %c0_i32 = arith.constant 0 : i32
    %c0_i32_0 = arith.constant 0 : i32
    return %arg1, %c0_i32 : i32, i32
  }
  func.func @transform_2(%arg0: i32, %arg1: i32, %arg2: i32) -> (i32, i32) {
    %c0_i32 = arith.constant 0 : i32
    %c0_i32_0 = arith.constant 0 : i32
    return %arg1, %c0_i32 : i32, i32
  }
  func.func @transform_3(%arg0: i32, %arg1: i32, %arg2: i32) -> (i32, i32, i32) {
    %c0_i32 = arith.constant 0 : i32
    return %arg0, %arg1, %arg2 : i32, i32, i32
  }
}

</mosaic_0001>

<bundles_post_ra>
// kernel: tpu_custom_call.1
= control target key start
LH: loop header
LB: loop body
LE: loop exit
PB: predicated region body
PF: predicated region fallthrough
CT: control target
= control target key end

     0   :  { %8 = vsyncpa [#allocation4], 0  ;;  %s3904_s0 = inlined_call_operand.vmem [shape: bf16[2,16,16,4], index: 0, kind: input, shape index: {}]   ;;  %s3905_s1 = inlined_call_operand.vmem [shape: bf16[4,36], index: 1, kind: input, shape index: {}]   ;;  %s3906_s2 = inlined_call_operand.vmem [shape: f32[4,1], index: 2, kind: input, shape index: {}]   ;;  %s3907_s3 = inlined_call_operand.hbm [shape: f32[2,4,256], index: 3, kind: output, shape index: {}]  }
   0x1   :  { %10 = vsyncpa [#allocation4 + $0x1], 0  ;;  %s2874_s12 = smov 0   ;;  %s2876_s13 = smov 0  }
   0x2   :  { %s2878_s14 = smov 0   ;;  %s2880_s15 = smov 0  }
   0x3   :  { %s2882_s16 = smov 0   ;;  %s2884_s17 = smov 0  }
   0x4   :  { %s2886_s18 = smov 0   ;;  %s2888_s19 = smov 0  }
   0x5 LB: > { %s2431_s20 = sadd.s32 4294967295, %s2842_s19   ;;  %s2432_s21 = sadd.s32 4294967294, %s2842_s19   ;;  %s2842_s19 = sphi %s2888_s19, %s16_s19   ;;  %s2838_s18 = sphi %s2886_s18, %s3928_s18   ;;  %s2834_s17 = sphi %s2884_s17, %s3927_s17   ;;  %s2830_s16 = sphi %s2882_s16, %s3926_s16   ;;  %s2826_s15 = sphi %s2880_s15, %s3925_s15   ;;  %s2822_s14 = sphi %s2878_s14, %s3924_s14   ;;  %s2818_s13 = sphi %s2876_s13, %s3923_s13   ;;  %s2814_s12 = sphi %s2874_s12, %s3922_s12  }
   0x6   : > { %s28_s22 = sadd.s32 1, %s2834_s17  ;;  %s35_s23 = sadd.s32 1, %s2838_s18 }
   0x7   : > { %p29_p0 = scmp.ge.s32.totalorder %s28_s22, 2  ;;  %p134_p1 = scmp.ne.s32.totalorder %s2822_s14, %s2818_s13 }
   0x8   : > { %p135_p2 = scmp.eq.s32.totalorder %s2431_s20, 3  ;;  %p140_p5 = scmp.ne.s32.totalorder %s2818_s13, %s2814_s12 }
   0x9   : > { %s3930_s22 = smov (%p29_p0, %s28_s22), 0  ;;  %s3932_s23 = smov (!%p29_p0, %s35_s23), %s2838_s18 }
   0xa   : > { %s120_s24 = ssub.s32 %s2834_s17, %s3930_s22  ;;  %p2925_p3 = por %p135_p2, %p134_p1 }
   0xb   : > { %p37_p4 = scmp.ge.s32.totalorder %s3932_s23, 2  ;;  %p141_p6 = scmp.eq.s32.totalorder %s2432_s21, 3 }
   0xc   : > { %p2437_p7 = scmp.ge.s32.totalorder %s2842_s19, 1  ;;  %p181_p9 = scmp.lt.s32.totalorder %s2842_s19, 5 }
   0xd   : > { %s3934_s23 = smov (%p37_p4, %s3932_s23), 0  ;;  %p2934_p8 = por %p141_p6, %p140_p5 }
   0xe   : > { %s117_s27 = ssub.s32 %s2838_s18, %s3934_s23  ;;  %s124_s28 = sadd.s32 1, %s2822_s14 }
   0xf   : > { %s121_s29 = sor.u32 %s120_s24, %s117_s27  ;;  %p182_p10 = pnand %p2437_p7, %p181_p9 }
  0x10   : > { %p122_p11 = scmp.eq.s32.totalorder %s121_s29, 0  ;;  %s210_s4 = sand.u32 (!%p182_p10), 1, %s2818_s13  }
  0x11   : > { %185 = sbr.rel (%p182_p10) target bundleno = 576 (0x240), region = 32  ;;  %p213_p12 = scmp.lt.s32.totalorder (!%p182_p10), %s2830_s16, 1 }
  0x12   : > { %s2943_s30 = scalar_select %p122_p11, %s2822_s14, %s124_s28  }
  0x13   : > { %s2949_s5 = sshll.u32 (!%p182_p10), %s210_s4, 2  ;;  %p2441_p13 = scmp.ne.s32.totalorder (!%p182_p10), %s2826_s15, 0 }
  0x14   : > { %s212_s11 = scalar_lea.vmem (!%p182_p10), [#allocation3], %s2949_s5 }
  0x16   : > { %s214_s6 = scalar_select %p213_p12, %s2830_s16, 1 }
  0x17   : > { %230 = sbr.rel (%p2441_p13) target bundleno = 133 (0x85), region = 36 }
  0x18   : > { %s2639_s7 = sshll.u32 %s214_s6, 7 }
  0x19   : > { %s2955_s10 = scalar_lea.vmem %s3904_s0, %s2639_s7 }
  0x1c   : > { %vm234_vm0 = vcmask 24576   ;;  %vm242_vm1 = vsmask.f32 256  ;;  %v244_v0 = vld [vmem:[#allocation2 + $0xc] sm:$0x1]  ;;  %vm231_vm5 = vcmask 27648  }
  0x1d   : > { %vm2961_vm2 = vmand %vm234_vm0, %vm242_vm1  ;;  %v247_v2 = vld [vmem:[#allocation2 + $0x18] sm:$0x1]  ;;  %v250_v3 = vld [vmem:[#allocation2 + $0x24] sm:$0x1]  ;;  %vm292_vm3 = vsmask.f32 7938 }
  0x1e   : > { %v245_v4 = vsel %vm2961_vm2, 0, %v244_v0  ;;  %v248_v5 = vsel %vm2961_vm2, 0, %v247_v2  ;;  %v251_v6 = vsel %vm2961_vm2, 0, %v250_v3  ;;  %v253_v7 = vld [vmem:[#allocation2 + $0x30] sm:$0x1]  ;;  %vm2995_vm4 = vmand %vm234_vm0, %vm292_vm3 }
  0x1f   : > { %246 = vst [vmem:[#allocation2 + $0xc] sm:$0x1] %v245_v4  ;;  %v254_v8 = vsel %vm2961_vm2, 0, %v253_v7  ;;  %v256_v9 = vld [vmem:[#allocation2 + $0x3c] sm:$0x1]  ;;  %vm3039_vm7 = vmand %vm231_vm5, %vm292_vm3 }
  0x20   : > { %249 = vst [vmem:[#allocation2 + $0x18] sm:$0x1] %v248_v5  ;;  %v257_v10 = vsel %vm2961_vm2, 0, %v256_v9  ;;  %v259_v11 = vld [vmem:[#allocation2 + $0x48] sm:$0x1] }
  0x21   : > { %252 = vst [vmem:[#allocation2 + $0x24] sm:$0x1] %v251_v6  ;;  %v260_v12 = vsel %vm2961_vm2, 0, %v259_v11  ;;  %v262_v13 = vld [vmem:[#allocation2 + $0x54] sm:$0x1]  ;;  %v2844_v11 = vmov 0  }
  0x22   : > { %255 = vst [vmem:[#allocation2 + $0x30] sm:$0x1] %v254_v8  ;;  %v263_v14 = vsel %vm2961_vm2, 0, %v262_v13  ;;  %v265_v15 = vld [vmem:[#allocation2 + $0x60] sm:$0x1] }
  0x23   : > { %258 = vst [vmem:[#allocation2 + $0x3c] sm:$0x1] %v257_v10  ;;  %v266_v16 = vsel %vm2961_vm2, 0, %v265_v15  ;;  %v268_v17 = vld [vmem:[#allocation2 + $0x6c] sm:$0x1] }
  0x24   : > { %261 = vst [vmem:[#allocation2 + $0x48] sm:$0x1] %v260_v12  ;;  %v269_v18 = vsel %vm2961_vm2, 0, %v268_v17  ;;  %v271_v19 = vld [vmem:[#allocation2 + $0x78] sm:$0x1] }
  0x25   : > { %264 = vst [vmem:[#allocation2 + $0x54] sm:$0x1] %v263_v14  ;;  %v272_v20 = vsel %vm2961_vm2, 0, %v271_v19  ;;  %v274_v21 = vld [vmem:[#allocation2 + $0x84] sm:$0x1] }
  0x26   : > { %267 = vst [vmem:[#allocation2 + $0x60] sm:$0x1] %v266_v16  ;;  %v275_v22 = vsel %vm2961_vm2, 0, %v274_v21  ;;  %v277_v23 = vld [vmem:[#allocation2 + $0x90] sm:$0x1] }
  0x27   : > { %270 = vst [vmem:[#allocation2 + $0x6c] sm:$0x1] %v269_v18  ;;  %v278_v24 = vsel %vm2961_vm2, 0, %v277_v23  ;;  %v280_v25 = vld [vmem:[#allocation2 + $0x9c] sm:$0x1] }
  0x28   : > { %273 = vst [vmem:[#allocation2 + $0x78] sm:$0x1] %v272_v20  ;;  %v281_v26 = vsel %vm2961_vm2, 0, %v280_v25  ;;  %v283_v27 = vld [vmem:[#allocation2 + $0xa8] sm:$0x1] }
  0x29   : > { %276 = vst [vmem:[#allocation2 + $0x84] sm:$0x1] %v275_v22  ;;  %v284_v28 = vsel %vm2961_vm2, 0, %v283_v27  ;;  %v286_v29 = vld [vmem:[#allocation2 + $0xb4] sm:$0x1] }
  0x2a   : > { %279 = vst [vmem:[#allocation2 + $0x90] sm:$0x1] %v278_v24  ;;  %v287_v31 = vsel %vm2961_vm2, 0, %v286_v29  ;;  %v289_v32 = vld [vmem:[#allocation2 + $0xc0] sm:$0x1] }
  0x2b   : > { %282 = vst [vmem:[#allocation2 + $0x9c] sm:$0x1] %v281_v26  ;;  %v290_v33 = vsel %vm2961_vm2, 0, %v289_v32  ;;  %v294_v34 = vld [vmem:[#allocation2 + $0x14] sm:$0x1] }
  0x2c   : > { %285 = vst [vmem:[#allocation2 + $0xa8] sm:$0x1] %v284_v28  ;;  %v295_v35 = vsel %vm2995_vm4, 0, %v294_v34  ;;  %v297_v36 = vld [vmem:[#allocation2 + $0x20] sm:$0x1] }
  0x2d   : > { %288 = vst [vmem:[#allocation2 + $0xb4] sm:$0x1] %v287_v31  ;;  %v298_v37 = vsel %vm2995_vm4, 0, %v297_v36  ;;  %v300_v38 = vld [vmem:[#allocation2 + $0x2c] sm:$0x1] }
  0x2e   : > { %291 = vst [vmem:[#allocation2 + $0xc0] sm:$0x1] %v290_v33  ;;  %v301_v39 = vsel %vm2995_vm4, 0, %v300_v38  ;;  %v303_v40 = vld [vmem:[#allocation2 + $0x38] sm:$0x1] }
  0x2f   : > { %296 = vst [vmem:[#allocation2 + $0x14] sm:$0x1] %v295_v35  ;;  %v304_v41 = vsel %vm2995_vm4, 0, %v303_v40  ;;  %v306_v42 = vld [vmem:[#allocation2 + $0x44] sm:$0x1] }
  0x30   : > { %299 = vst [vmem:[#allocation2 + $0x20] sm:$0x1] %v298_v37  ;;  %v307_v43 = vsel %vm2995_vm4, 0, %v306_v42  ;;  %v309_v44 = vld [vmem:[#allocation2 + $0x50] sm:$0x1] }
  0x31   : > { %302 = vst [vmem:[#allocation2 + $0x2c] sm:$0x1] %v301_v39  ;;  %v310_v45 = vsel %vm2995_vm4, 0, %v309_v44  ;;  %v312_v46 = vld [vmem:[#allocation2 + $0x5c] sm:$0x1] }
  0x32   : > { %305 = vst [vmem:[#allocation2 + $0x38] sm:$0x1] %v304_v41  ;;  %v313_v47 = vsel %vm2995_vm4, 0, %v312_v46  ;;  %v315_v48 = vld [vmem:[#allocation2 + $0x68] sm:$0x1] }
  0x33   : > { %308 = vst [vmem:[#allocation2 + $0x44] sm:$0x1] %v307_v43  ;;  %v316_v49 = vsel %vm2995_vm4, 0, %v315_v48  ;;  %v318_v50 = vld [vmem:[#allocation2 + $0x74] sm:$0x1] }
  0x34   : > { %311 = vst [vmem:[#allocation2 + $0x50] sm:$0x1] %v310_v45  ;;  %v319_v51 = vsel %vm2995_vm4, 0, %v318_v50  ;;  %v321_v52 = vld [vmem:[#allocation2 + $0x80] sm:$0x1] }
  0x35   : > { %314 = vst [vmem:[#allocation2 + $0x5c] sm:$0x1] %v313_v47  ;;  %v322_v53 = vsel %vm2995_vm4, 0, %v321_v52  ;;  %v324_v54 = vld [vmem:[#allocation2 + $0x8c] sm:$0x1] }
  0x36   : > { %317 = vst [vmem:[#allocation2 + $0x68] sm:$0x1] %v316_v49  ;;  %v325_v55 = vsel %vm2995_vm4, 0, %v324_v54  ;;  %v327_v56 = vld [vmem:[#allocation2 + $0x98] sm:$0x1] }
  0x37   : > { %320 = vst [vmem:[#allocation2 + $0x74] sm:$0x1] %v319_v51  ;;  %v328_v57 = vsel %vm2995_vm4, 0, %v327_v56  ;;  %v330_v58 = vld [vmem:[#allocation2 + $0xa4] sm:$0x1] }
  0x38   : > { %323 = vst [vmem:[#allocation2 + $0x80] sm:$0x1] %v322_v53  ;;  %v331_v59 = vsel %vm2995_vm4, 0, %v330_v58  ;;  %v333_v60 = vld [vmem:[#allocation2 + $0xb0] sm:$0x1] }
  0x39   : > { %326 = vst [vmem:[#allocation2 + $0x8c] sm:$0x1] %v325_v55  ;;  %v334_v61 = vsel %vm2995_vm4, 0, %v333_v60  ;;  %v336_v62 = vld [vmem:[#allocation2 + $0xbc] sm:$0x1] }
  0x3a   : > { %329 = vst [vmem:[#allocation2 + $0x98] sm:$0x1] %v328_v57  ;;  %v337_v63 = vsel %vm2995_vm4, 0, %v336_v62  ;;  %v339_v0 = vld [vmem:[#allocation2 + $0xc8] sm:$0x1] }
  0x3b   : > { %332 = vst [vmem:[#allocation2 + $0xa4] sm:$0x1] %v331_v59  ;;  %v340_v2 = vsel %vm2995_vm4, 0, %v339_v0  ;;  %v342_v3 = vld [vmem:[%s2955_s10] sm:$0xf] }
  0x3c   : > { %335 = vst [vmem:[#allocation2 + $0xb0] sm:$0x1] %v334_v61  ;;  %v377_v4 = vshrl.u32 %v342_v3, 16  ;;  %v380_v5 = vshll.u32 %v342_v3, 16  ;;  %v343_v6 = vld [vmem:[%s2955_s10 + $0x4] sm:$0xf] }
  0x3d   : > { %338 = vst [vmem:[#allocation2 + $0xbc] sm:$0x1] %v337_v63  ;;  %vm374_vm6 = vsmask.f32 4368  ;;  %v385_v8 = vshrl.u32 %v343_v6, 16  ;;  %v388_v9 = vshll.u32 %v343_v6, 16 }
  0x3e   : > { %341 = vst [vmem:[#allocation2 + $0xc8] sm:$0x1] %v340_v2  ;;  %v379_v7 = vrot.slane %v377_v4, 7  ;;  %v698_v12 = vld [vmem:[#allocation2 + $0xc] sm:$0xf]  ;;  %vm3049_vm8 = vmor %vm242_vm1, %vm374_vm6 }
  0x3f   : > { %232 = vst.msk [vmem:[#allocation2] sm:$0xf] %vm231_vm5, %v2844_v11  ;;  %v344_v13 = vld [vmem:[%s2955_s10 + $0x8] sm:$0xf]  ;;  %v387_v16 = vrot.slane %v385_v8, 7 }
  0x40   : > { %233 = vst.msk [vmem:[#allocation2 + $0x4] sm:$0xf] %vm231_vm5, %v2844_v11  ;;  %v382_v14 = vor.u32 %v380_v5, %v379_v7  ;;  %v383_v15 = vrot.slane %v379_v7, 4  ;;  %v394_v17 = vshrl.u32 %v344_v13, 16  ;;  %v702_v19 = vld [vmem:[#allocation2 + $0x14] sm:$0x1] }
  0x41   : > { %235 = vst.msk [vmem:[#allocation2 + $0x8] sm:$0x1] %vm234_vm0, %v2844_v11  ;;  %v397_v20 = vshll.u32 %v344_v13, 16  ;;  %v390_v22 = vor.u32 %v388_v9, %v387_v16  ;;  %v392_v23 = vrot.slane %v387_v16, 4  ;;  %v345_v25 = vld [vmem:[%s2955_s10 + $0xc] sm:$0xf] }
  0x42   : > { %237 = vst.msk [vmem:[#allocation2 + $0xcc] sm:$0xf] %vm231_vm5, %v2844_v11  ;;  %v699_v21 = vsel %vm3039_vm7, %v382_v14, %v698_v12  ;;  %v396_v24 = vrot.slane %v394_v17, 7  ;;  %v705_v26 = vld [vmem:[#allocation2 + $0x18] sm:$0xf]  ;;  %v402_v27 = vshrl.u32 %v345_v25, 16 }
  0x43   : > { %238 = vst.msk [vmem:[#allocation2 + $0xd0] sm:$0xf] %vm231_vm5, %v2844_v11  ;;  %v405_v28 = vshll.u32 %v345_v25, 16  ;;  %v391_v29 = vsel %vm3049_vm8, %v383_v15, %v390_v22  ;;  %v703_v30 = vsel %vm2961_vm2, %v392_v23, %v702_v19  ;;  %v346_v32 = vld [vmem:[%s2955_s10 + $0x10] sm:$0xf] }
  0x44   : > { %239 = vst.msk [vmem:[#allocation2 + $0xd4] sm:$0x1] %vm234_vm0, %v2844_v11  ;;  %v399_v31 = vor.u32 %v397_v20, %v396_v24  ;;  %v400_v33 = vrot.slane %v396_v24, 4  ;;  %v404_v34 = vrot.slane %v402_v27, 7  ;;  %v411_v35 = vshrl.u32 %v346_v32, 16 }
  0x45   : > { %700 = vst [vmem:[#allocation2 + $0xc] sm:$0xf] %v699_v21  ;;  %v414_v36 = vshll.u32 %v346_v32, 16  ;;  %v709_v38 = vld [vmem:[#allocation2 + $0x20] sm:$0x1] }
  0x46   : > { %701 = vst.msk [vmem:[#allocation2 + $0x10] sm:$0xf] %vm231_vm5, %v391_v29  ;;  %v706_v37 = vsel %vm3039_vm7, %v399_v31, %v705_v26  ;;  %v347_v39 = vld [vmem:[%s2955_s10 + $0x14] sm:$0xf]  ;;  %v407_v40 = vor.u32 %v405_v28, %v404_v34  ;;  %v409_v41 = vrot.slane %v404_v34, 4  ;;  %v413_v42 = vrot.slane %v411_v35, 7 }
  0x47   : > { %704 = vst [vmem:[#allocation2 + $0x14] sm:$0x1] %v703_v30  ;;  %v419_v43 = vshrl.u32 %v347_v39, 16  ;;  %v712_v44 = vld [vmem:[#allocation2 + $0x24] sm:$0xf]  ;;  %v422_v45 = vshll.u32 %v347_v39, 16 }
  0x48   : > { %707 = vst [vmem:[#allocation2 + $0x18] sm:$0xf] %v706_v37  ;;  %v408_v46 = vsel %vm3049_vm8, %v400_v33, %v407_v40  ;;  %v710_v47 = vsel %vm2961_vm2, %v409_v41, %v709_v38  ;;  %v416_v48 = vor.u32 %v414_v36, %v413_v42  ;;  %v348_v49 = vld [vmem:[%s2955_s10 + $0x18] sm:$0xf]  ;;  %v417_v50 = vrot.slane %v413_v42, 4 }
  0x49   : > { %708 = vst.msk [vmem:[#allocation2 + $0x1c] sm:$0xf] %vm231_vm5, %v408_v46  ;;  %v421_v51 = vrot.slane %v419_v43, 7  ;;  %v428_v52 = vshrl.u32 %v348_v49, 16  ;;  %v431_v53 = vshll.u32 %v348_v49, 16 }
  0x4a   : > { %711 = vst [vmem:[#allocation2 + $0x20] sm:$0x1] %v710_v47  ;;  %v713_v54 = vsel %vm3039_vm7, %v416_v48, %v712_v44  ;;  %v716_v55 = vld [vmem:[#allocation2 + $0x2c] sm:$0x1]  ;;  %v349_v56 = vld [vmem:[%s2955_s10 + $0x1c] sm:$0xf] }
  0x4b   : > { %714 = vst [vmem:[#allocation2 + $0x24] sm:$0xf] %v713_v54  ;;  %v424_v57 = vor.u32 %v422_v45, %v421_v51  ;;  %v426_v58 = vrot.slane %v421_v51, 4  ;;  %v430_v59 = vrot.slane %v428_v52, 7  ;;  %v436_v60 = vshrl.u32 %v349_v56, 16 }
  0x4c   : > { %v719_v61 = vld [vmem:[#allocation2 + $0x30] sm:$0xf]  ;;  %v439_v62 = vshll.u32 %v349_v56, 16  ;;  %v350_v63 = vld [vmem:[%s2955_s10 + $0x20] sm:$0xf] }
  0x4d   : > { %v425_v0 = vsel %vm3049_vm8, %v417_v50, %v424_v57  ;;  %v717_v2 = vsel %vm2961_vm2, %v426_v58, %v716_v55  ;;  %v433_v3 = vor.u32 %v431_v53, %v430_v59  ;;  %v434_v4 = vrot.slane %v430_v59, 4  ;;  %v723_v5 = vld [vmem:[#allocation2 + $0x38] sm:$0x1]  ;;  %v351_v6 = vld [vmem:[%s2955_s10 + $0x24] sm:$0xf] }
  0x4e   : > { %715 = vst.msk [vmem:[#allocation2 + $0x28] sm:$0xf] %vm231_vm5, %v425_v0  ;;  %v438_v7 = vrot.slane %v436_v60, 7  ;;  %v445_v8 = vshrl.u32 %v350_v63, 16  ;;  %v448_v9 = vshll.u32 %v350_v63, 16  ;;  %v453_v11 = vshrl.u32 %v351_v6, 16 }
  0x4f   : > { %718 = vst [vmem:[#allocation2 + $0x2c] sm:$0x1] %v717_v2  ;;  %v720_v12 = vsel %vm3039_vm7, %v433_v3, %v719_v61  ;;  %v726_v13 = vld [vmem:[#allocation2 + $0x3c] sm:$0xf]  ;;  %v456_v14 = vshll.u32 %v351_v6, 16 }
  0x50   : > { %v352_v15 = vld [vmem:[%s2955_s10 + $0x28] sm:$0xf]  ;;  %721 = vst [vmem:[#allocation2 + $0x30] sm:$0xf] %v720_v12  ;;  %v441_v16 = vor.u32 %v439_v62, %v438_v7  ;;  %v443_v17 = vrot.slane %v438_v7, 4  ;;  %v447_v19 = vrot.slane %v445_v8, 7 }
  0x51   : > { %v455_v20 = vrot.slane %v453_v11, 7  ;;  %v730_v21 = vld [vmem:[#allocation2 + $0x44] sm:$0x1]  ;;  %v462_v22 = vshrl.u32 %v352_v15, 16  ;;  %v465_v23 = vshll.u32 %v352_v15, 16 }
  0x52   : > { %v353_v24 = vld [vmem:[%s2955_s10 + $0x2c] sm:$0xf]  ;;  %v442_v25 = vsel %vm3049_vm8, %v434_v4, %v441_v16  ;;  %v724_v26 = vsel %vm2961_vm2, %v443_v17, %v723_v5  ;;  %v450_v27 = vor.u32 %v448_v9, %v447_v19  ;;  %v451_v28 = vrot.slane %v447_v19, 4  ;;  %v733_v29 = vld [vmem:[#allocation2 + $0x48] sm:$0xf] }
  0x53   : > { %v354_v30 = vld [vmem:[%s2955_s10 + $0x30] sm:$0xf]  ;;  %722 = vst.msk [vmem:[#allocation2 + $0x34] sm:$0xf] %vm231_vm5, %v442_v25  ;;  %v458_v31 = vor.u32 %v456_v14, %v455_v20  ;;  %v460_v32 = vrot.slane %v455_v20, 4  ;;  %v464_v33 = vrot.slane %v462_v22, 7 }
  0x54   : > { %v470_v34 = vshrl.u32 %v353_v24, 16  ;;  %725 = vst [vmem:[#allocation2 + $0x38] sm:$0x1] %v724_v26  ;;  %v727_v35 = vsel %vm3039_vm7, %v450_v27, %v726_v13  ;;  %v473_v36 = vshll.u32 %v353_v24, 16  ;;  %v479_v37 = vshrl.u32 %v354_v30, 16 }
  0x55   : > { %v482_v38 = vshll.u32 %v354_v30, 16  ;;  %728 = vst [vmem:[#allocation2 + $0x3c] sm:$0xf] %v727_v35  ;;  %v459_v39 = vsel %vm3049_vm8, %v451_v28, %v458_v31  ;;  %v731_v40 = vsel %vm2961_vm2, %v460_v32, %v730_v21  ;;  %v467_v41 = vor.u32 %v465_v23, %v464_v33  ;;  %v737_v43 = vld [vmem:[#allocation2 + $0x50] sm:$0x1] }
  0x56   : > { %v468_v42 = vrot.slane %v464_v33, 4  ;;  %729 = vst.msk [vmem:[#allocation2 + $0x40] sm:$0xf] %vm231_vm5, %v459_v39  ;;  %v472_v44 = vrot.slane %v470_v34, 7  ;;  %v481_v45 = vrot.slane %v479_v37, 7 }
  0x57   : > { %v355_v46 = vld [vmem:[%s2955_s10 + $0x34] sm:$0xf]  ;;  %732 = vst [vmem:[#allocation2 + $0x44] sm:$0x1] %v731_v40  ;;  %v734_v47 = vsel %vm3039_vm7, %v467_v41, %v733_v29  ;;  %v356_v54 = vld [vmem:[%s2955_s10 + $0x38] sm:$0xf] }
  0x58   : > { %v740_v48 = vld [vmem:[#allocation2 + $0x54] sm:$0xf]  ;;  %v487_v49 = vshrl.u32 %v355_v46, 16  ;;  %v490_v50 = vshll.u32 %v355_v46, 16  ;;  %735 = vst [vmem:[#allocation2 + $0x48] sm:$0xf] %v734_v47  ;;  %v475_v51 = vor.u32 %v473_v36, %v472_v44  ;;  %v484_v53 = vor.u32 %v482_v38, %v481_v45 }
  0x59   : > { %v477_v52 = vrot.slane %v472_v44, 4  ;;  %v485_v55 = vrot.slane %v481_v45, 4  ;;  %v744_v57 = vld [vmem:[#allocation2 + $0x5c] sm:$0x1]  ;;  %v496_v58 = vshrl.u32 %v356_v54, 16  ;;  %v499_v59 = vshll.u32 %v356_v54, 16 }
  0x5a   : > { %v489_v56 = vrot.slane %v487_v49, 7  ;;  %v476_v60 = vsel %vm3049_vm8, %v468_v42, %v475_v51  ;;  %v741_v62 = vsel %vm3039_vm7, %v484_v53, %v740_v48  ;;  %v747_v63 = vld [vmem:[#allocation2 + $0x60] sm:$0xf]  ;;  %v357_v0 = vld [vmem:[%s2955_s10 + $0x3c] sm:$0xf] }
  0x5b   : > { %v738_v61 = vsel %vm2961_vm2, %v477_v52, %v737_v43  ;;  %v358_v2 = vld [vmem:[%s2955_s10 + $0x40] sm:$0xf]  ;;  %736 = vst.msk [vmem:[#allocation2 + $0x4c] sm:$0xf] %vm231_vm5, %v476_v60  ;;  %v498_v5 = vrot.slane %v496_v58, 7  ;;  %v504_v6 = vshrl.u32 %v357_v0, 16 }
  0x5c   : > { %v492_v3 = vor.u32 %v490_v50, %v489_v56  ;;  %v494_v4 = vrot.slane %v489_v56, 4  ;;  %739 = vst [vmem:[#allocation2 + $0x50] sm:$0x1] %v738_v61  ;;  %v507_v7 = vshll.u32 %v357_v0, 16  ;;  %v513_v8 = vshrl.u32 %v358_v2, 16 }
  0x5d   : > { %v516_v9 = vshll.u32 %v358_v2, 16  ;;  %742 = vst [vmem:[#allocation2 + $0x54] sm:$0xf] %v741_v62  ;;  %v501_v13 = vor.u32 %v499_v59, %v498_v5  ;;  %v502_v14 = vrot.slane %v498_v5, 4  ;;  %v751_v15 = vld [vmem:[#allocation2 + $0x68] sm:$0x1] }
  0x5e   : > { %v493_v11 = vsel %vm3049_vm8, %v485_v55, %v492_v3  ;;  %v745_v12 = vsel %vm2961_vm2, %v494_v4, %v744_v57  ;;  %v506_v16 = vrot.slane %v504_v6, 7  ;;  %v515_v17 = vrot.slane %v513_v8, 7  ;;  %v359_v19 = vld [vmem:[%s2955_s10 + $0x44] sm:$0xf]  ;;  %v754_v21 = vld [vmem:[#allocation2 + $0x6c] sm:$0xf] }
  0x5f   : > { %743 = vst.msk [vmem:[#allocation2 + $0x58] sm:$0xf] %vm231_vm5, %v493_v11  ;;  %v748_v20 = vsel %vm3039_vm7, %v501_v13, %v747_v63  ;;  %v521_v22 = vshrl.u32 %v359_v19, 16  ;;  %v524_v23 = vshll.u32 %v359_v19, 16  ;;  %v360_v27 = vld [vmem:[%s2955_s10 + $0x48] sm:$0xf] }
  0x60   : > { %746 = vst [vmem:[#allocation2 + $0x5c] sm:$0x1] %v745_v12  ;;  %v509_v24 = vor.u32 %v507_v7, %v506_v16  ;;  %v511_v25 = vrot.slane %v506_v16, 4  ;;  %v518_v26 = vor.u32 %v516_v9, %v515_v17  ;;  %v519_v28 = vrot.slane %v515_v17, 4  ;;  %v758_v30 = vld [vmem:[#allocation2 + $0x74] sm:$0x1] }
  0x61   : > { %749 = vst [vmem:[#allocation2 + $0x60] sm:$0xf] %v748_v20  ;;  %v523_v29 = vrot.slane %v521_v22, 7  ;;  %v530_v31 = vshrl.u32 %v360_v27, 16  ;;  %v533_v32 = vshll.u32 %v360_v27, 16 }
  0x62   : > { %v510_v33 = vsel %vm3049_vm8, %v502_v14, %v509_v24  ;;  %v752_v34 = vsel %vm2961_vm2, %v511_v25, %v751_v15  ;;  %v755_v35 = vsel %vm3039_vm7, %v518_v26, %v754_v21  ;;  %v761_v36 = vld [vmem:[#allocation2 + $0x78] sm:$0xf]  ;;  %v361_v37 = vld [vmem:[%s2955_s10 + $0x4c] sm:$0xf]  ;;  %v362_v38 = vld [vmem:[%s2955_s10 + $0x50] sm:$0xf] }
  0x63   : > { %750 = vst.msk [vmem:[#allocation2 + $0x64] sm:$0xf] %vm231_vm5, %v510_v33  ;;  %v526_v39 = vor.u32 %v524_v23, %v523_v29  ;;  %v528_v40 = vrot.slane %v523_v29, 4  ;;  %v532_v41 = vrot.slane %v530_v31, 7  ;;  %v538_v42 = vshrl.u32 %v361_v37, 16 }
  0x64   : > { %753 = vst [vmem:[#allocation2 + $0x68] sm:$0x1] %v752_v34  ;;  %v541_v43 = vshll.u32 %v361_v37, 16  ;;  %v547_v44 = vshrl.u32 %v362_v38, 16  ;;  %v550_v45 = vshll.u32 %v362_v38, 16 }
  0x65   : > { %756 = vst [vmem:[#allocation2 + $0x6c] sm:$0xf] %v755_v35  ;;  %v527_v46 = vsel %vm3049_vm8, %v519_v28, %v526_v39  ;;  %v759_v47 = vsel %vm2961_vm2, %v528_v40, %v758_v30  ;;  %v535_v48 = vor.u32 %v533_v32, %v532_v41  ;;  %v536_v49 = vrot.slane %v532_v41, 4  ;;  %v765_v50 = vld [vmem:[#allocation2 + $0x80] sm:$0x1] }
  0x66   : > { %757 = vst.msk [vmem:[#allocation2 + $0x70] sm:$0xf] %vm231_vm5, %v527_v46  ;;  %v540_v51 = vrot.slane %v538_v42, 7  ;;  %v549_v52 = vrot.slane %v547_v44, 7  ;;  %v363_v53 = vld [vmem:[%s2955_s10 + $0x54] sm:$0xf] }
  0x67   : > { %760 = vst [vmem:[#allocation2 + $0x74] sm:$0x1] %v759_v47  ;;  %v762_v54 = vsel %vm3039_vm7, %v535_v48, %v761_v36  ;;  %v768_v55 = vld [vmem:[#allocation2 + $0x84] sm:$0xf]  ;;  %v555_v56 = vshrl.u32 %v363_v53, 16  ;;  %v558_v57 = vshll.u32 %v363_v53, 16 }
  0x68   : > { %763 = vst [vmem:[#allocation2 + $0x78] sm:$0xf] %v762_v54  ;;  %v543_v58 = vor.u32 %v541_v43, %v540_v51  ;;  %v545_v59 = vrot.slane %v540_v51, 4  ;;  %v552_v60 = vor.u32 %v550_v45, %v549_v52  ;;  %v364_v61 = vld [vmem:[%s2955_s10 + $0x58] sm:$0xf]  ;;  %v553_v62 = vrot.slane %v549_v52, 4 }
  0x69   : > { %v557_v63 = vrot.slane %v555_v56, 7  ;;  %v772_v0 = vld [vmem:[#allocation2 + $0x8c] sm:$0x1]  ;;  %v564_v2 = vshrl.u32 %v364_v61, 16  ;;  %v567_v3 = vshll.u32 %v364_v61, 16 }
  0x6a   : > { %v544_v4 = vsel %vm3049_vm8, %v536_v49, %v543_v58  ;;  %v766_v5 = vsel %vm2961_vm2, %v545_v59, %v765_v50  ;;  %v769_v6 = vsel %vm3039_vm7, %v552_v60, %v768_v55  ;;  %v775_v7 = vld [vmem:[#allocation2 + $0x90] sm:$0xf]  ;;  %v365_v8 = vld [vmem:[%s2955_s10 + $0x5c] sm:$0xf]  ;;  %v366_v9 = vld [vmem:[%s2955_s10 + $0x60] sm:$0xf] }
  0x6b   : > { %764 = vst.msk [vmem:[#allocation2 + $0x7c] sm:$0xf] %vm231_vm5, %v544_v4  ;;  %v560_v11 = vor.u32 %v558_v57, %v557_v63  ;;  %v562_v12 = vrot.slane %v557_v63, 4  ;;  %v566_v13 = vrot.slane %v564_v2, 7  ;;  %v572_v14 = vshrl.u32 %v365_v8, 16 }
  0x6c   : > { %767 = vst [vmem:[#allocation2 + $0x80] sm:$0x1] %v766_v5  ;;  %v575_v15 = vshll.u32 %v365_v8, 16  ;;  %v581_v16 = vshrl.u32 %v366_v9, 16  ;;  %v584_v17 = vshll.u32 %v366_v9, 16 }
  0x6d   : > { %770 = vst [vmem:[#allocation2 + $0x84] sm:$0xf] %v769_v6  ;;  %v561_v19 = vsel %vm3049_vm8, %v553_v62, %v560_v11  ;;  %v773_v20 = vsel %vm2961_vm2, %v562_v12, %v772_v0  ;;  %v569_v21 = vor.u32 %v567_v3, %v566_v13  ;;  %v570_v22 = vrot.slane %v566_v13, 4  ;;  %v779_v23 = vld [vmem:[#allocation2 + $0x98] sm:$0x1] }
  0x6e   : > { %771 = vst.msk [vmem:[#allocation2 + $0x88] sm:$0xf] %vm231_vm5, %v561_v19  ;;  %v574_v24 = vrot.slane %v572_v14, 7  ;;  %v583_v25 = vrot.slane %v581_v16, 7  ;;  %v367_v26 = vld [vmem:[%s2955_s10 + $0x64] sm:$0xf] }
  0x6f   : > { %774 = vst [vmem:[#allocation2 + $0x8c] sm:$0x1] %v773_v20  ;;  %v776_v27 = vsel %vm3039_vm7, %v569_v21, %v775_v7  ;;  %v782_v28 = vld [vmem:[#allocation2 + $0x9c] sm:$0xf]  ;;  %v589_v29 = vshrl.u32 %v367_v26, 16  ;;  %v592_v30 = vshll.u32 %v367_v26, 16 }
  0x70   : > { %777 = vst [vmem:[#allocation2 + $0x90] sm:$0xf] %v776_v27  ;;  %v577_v31 = vor.u32 %v575_v15, %v574_v24  ;;  %v579_v32 = vrot.slane %v574_v24, 4  ;;  %v586_v33 = vor.u32 %v584_v17, %v583_v25  ;;  %v368_v34 = vld [vmem:[%s2955_s10 + $0x68] sm:$0xf]  ;;  %v587_v35 = vrot.slane %v583_v25, 4 }
  0x71   : > { %v591_v36 = vrot.slane %v589_v29, 7  ;;  %v786_v37 = vld [vmem:[#allocation2 + $0xa4] sm:$0x1]  ;;  %v598_v38 = vshrl.u32 %v368_v34, 16  ;;  %v601_v39 = vshll.u32 %v368_v34, 16 }
  0x72   : > { %v578_v40 = vsel %vm3049_vm8, %v570_v22, %v577_v31  ;;  %v780_v41 = vsel %vm2961_vm2, %v579_v32, %v779_v23  ;;  %v783_v42 = vsel %vm3039_vm7, %v586_v33, %v782_v28  ;;  %v789_v43 = vld [vmem:[#allocation2 + $0xa8] sm:$0xf]  ;;  %v369_v44 = vld [vmem:[%s2955_s10 + $0x6c] sm:$0xf]  ;;  %v370_v45 = vld [vmem:[%s2955_s10 + $0x70] sm:$0xf] }
  0x73   : > { %778 = vst.msk [vmem:[#allocation2 + $0x94] sm:$0xf] %vm231_vm5, %v578_v40  ;;  %v594_v46 = vor.u32 %v592_v30, %v591_v36  ;;  %v596_v47 = vrot.slane %v591_v36, 4  ;;  %v600_v48 = vrot.slane %v598_v38, 7  ;;  %v606_v49 = vshrl.u32 %v369_v44, 16 }
  0x74   : > { %781 = vst [vmem:[#allocation2 + $0x98] sm:$0x1] %v780_v41  ;;  %v609_v50 = vshll.u32 %v369_v44, 16  ;;  %v615_v51 = vshrl.u32 %v370_v45, 16  ;;  %v618_v52 = vshll.u32 %v370_v45, 16 }
  0x75   : > { %784 = vst [vmem:[#allocation2 + $0x9c] sm:$0xf] %v783_v42  ;;  %v595_v53 = vsel %vm3049_vm8, %v587_v35, %v594_v46  ;;  %v787_v54 = vsel %vm2961_vm2, %v596_v47, %v786_v37  ;;  %v603_v55 = vor.u32 %v601_v39, %v600_v48  ;;  %v604_v56 = vrot.slane %v600_v48, 4  ;;  %v793_v57 = vld [vmem:[#allocation2 + $0xb0] sm:$0x1] }
  0x76   : > { %785 = vst.msk [vmem:[#allocation2 + $0xa0] sm:$0xf] %vm231_vm5, %v595_v53  ;;  %v608_v58 = vrot.slane %v606_v49, 7  ;;  %v617_v59 = vrot.slane %v615_v51, 7  ;;  %v371_v60 = vld [vmem:[%s2955_s10 + $0x74] sm:$0xf] }
  0x77   : > { %788 = vst [vmem:[#allocation2 + $0xa4] sm:$0x1] %v787_v54  ;;  %v790_v61 = vsel %vm3039_vm7, %v603_v55, %v789_v43  ;;  %v796_v62 = vld [vmem:[#allocation2 + $0xb4] sm:$0xf]  ;;  %v623_v63 = vshrl.u32 %v371_v60, 16  ;;  %v626_v0 = vshll.u32 %v371_v60, 16 }
  0x78   : > { %791 = vst [vmem:[#allocation2 + $0xa8] sm:$0xf] %v790_v61  ;;  %v611_v2 = vor.u32 %v609_v50, %v608_v58  ;;  %v613_v3 = vrot.slane %v608_v58, 4  ;;  %v620_v4 = vor.u32 %v618_v52, %v617_v59  ;;  %v372_v5 = vld [vmem:[%s2955_s10 + $0x78] sm:$0xf]  ;;  %v621_v6 = vrot.slane %v617_v59, 4 }
  0x79   : > { %v625_v7 = vrot.slane %v623_v63, 7  ;;  %v632_v8 = vshrl.u32 %v372_v5, 16  ;;  %v635_v9 = vshll.u32 %v372_v5, 16  ;;  %v800_v14 = vld [vmem:[#allocation2 + $0xbc] sm:$0x1] }
  0x7a   : > { %v612_v11 = vsel %vm3049_vm8, %v604_v56, %v611_v2  ;;  %v794_v12 = vsel %vm2961_vm2, %v613_v3, %v793_v57  ;;  %v797_v13 = vsel %vm3039_vm7, %v620_v4, %v796_v62  ;;  %v373_v15 = vld [vmem:[%s2955_s10 + $0x7c] sm:$0xf]  ;;  %v803_v21 = vld [vmem:[#allocation2 + $0xc0] sm:$0xf]  ;;  %v807_v29 = vld [vmem:[#allocation2 + $0xc8] sm:$0x1] }
  0x7b   : > { %792 = vst.msk [vmem:[#allocation2 + $0xac] sm:$0xf] %vm231_vm5, %v612_v11  ;;  %v628_v16 = vor.u32 %v626_v0, %v625_v7  ;;  %v630_v17 = vrot.slane %v625_v7, 4  ;;  %v634_v19 = vrot.slane %v632_v8, 7  ;;  %v640_v20 = vshrl.u32 %v373_v15, 16 }
  0x7c   : > { %795 = vst [vmem:[#allocation2 + $0xb0] sm:$0x1] %v794_v12  ;;  %v643_v22 = vshll.u32 %v373_v15, 16 }
  0x7d   : > { %798 = vst [vmem:[#allocation2 + $0xb4] sm:$0xf] %v797_v13  ;;  %v629_v23 = vsel %vm3049_vm8, %v621_v6, %v628_v16  ;;  %v801_v24 = vsel %vm2961_vm2, %v630_v17, %v800_v14  ;;  %v637_v25 = vor.u32 %v635_v9, %v634_v19  ;;  %v638_v26 = vrot.slane %v634_v19, 4 }
  0x7e   : > { %799 = vst.msk [vmem:[#allocation2 + $0xb8] sm:$0xf] %vm231_vm5, %v629_v23  ;;  %v642_v27 = vrot.slane %v640_v20, 7 }
  0x7f   : > { %802 = vst [vmem:[#allocation2 + $0xbc] sm:$0x1] %v801_v24  ;;  %v804_v28 = vsel %vm3039_vm7, %v637_v25, %v803_v21 }
  0x80   : > { %805 = vst [vmem:[#allocation2 + $0xc0] sm:$0xf] %v804_v28  ;;  %v645_v30 = vor.u32 %v643_v22, %v642_v27  ;;  %v647_v31 = vrot.slane %v642_v27, 4 }
  0x82   : > { %v646_v32 = vsel %vm3049_vm8, %v638_v26, %v645_v30  ;;  %v808_v33 = vsel %vm2961_vm2, %v647_v31, %v807_v29 }
  0x83   : > { %806 = vst.msk [vmem:[#allocation2 + $0xc4] sm:$0xf] %vm231_vm5, %v646_v32 }
  0x84   : > { %809 = vst [vmem:[#allocation2 + $0xc8] sm:$0x1] %v808_v33 }
  0x85 PF: > { %s2640_s20 = smul.u32 96, %s2826_s15  ;;  %vm1065_vm9 = vcmask 1042432   ;;  %vm1066_vm10 = vcmask 1046532   ;;  %vm838_vm11 = vsmask.f32 3328  ;;  %s2845_s24 = smov 12  }
  0x86   : > { %vm839_vm12 = vsmask.f32 7440  ;;  %vm3204_vm13 = vmor %vm1065_vm9, %vm1066_vm10  ;;  %s2846_s27 = smov 8   ;;  %s2847_s28 = smov 24   ;;  %vm2108_vm15 = vcmask 31744   ;;  %vm2133_vm0 = vcmask 64512  }
  0x87   : > { %s3198_s21 = scalar_lea.vmem [#allocation2], %s2640_s20  ;;  %vm3233_vm14 = vmor %vm838_vm11, %vm839_vm12  ;;  %s2848_s29 = smov 32   ;;  %vm2150_vm1 = vcmask 97280   ;;  %vm2167_vm2 = vcmask 130048   ;;  %vm2184_vm3 = vcmask 162816   ;;  %vm2201_vm4 = vcmask 195584  }
  0x88   : > { %s2849_s6 = smov 4   ;;  %s2850_s7 = smov 16   ;;  %vm2218_vm5 = vcmask 228352   ;;  %vm2235_vm6 = vcmask 261120   ;;  %vm2259_vm7 = vcmask 293888  }
  0x89   : > { %s2851_s8 = smov 28   ;;  %s2852_s9 = smov 20  }
  0x8b   : > { %v2656_v1 = vld [vmem:[%s3198_s21 + $0x60] sm:$0xff]  ;;  %v829_v10 = vld [vmem:[%s3198_s21 + $0x58] sm:$0xf]  ;;  %v837_v18 = vld [vmem:[%s3198_s21 + $0x5c] sm:$0x1] }
  0x8c   : > { %v1029_v34 = vshll.u32 %v837_v18, 16  ;;  %v1040_v35 = vld [vmem:[%s3198_s21 + $0x54] sm:$0xe]  ;;  %v1119_v37 = vrot.slane %v829_v10, 5  ;;  %v1122_v38 = vrot.slane %v837_v18, 5  ;;  %v1023_v39 = vshrl.u32 %v829_v10, 16  ;;  %1898 = vrot.lane.b32.xlu1 %v2656_v1, %s2845_s24 }
  0x8d   : > { %v2452_v40 = vrot.slane %v1040_v35, 9  ;;  %v3210_v41 = vld [vmem:[%s3198_s21 + $0x70] sm:$0xf]  ;;  %v3213_v42 = vld [vmem:[%s3198_s21 + $0x74] sm:$0x1]  ;;  %v1019_v43 = vshll.u32 %v829_v10, 16 }
  0x8e   : > { %v1121_v44 = vrot.slane %v1119_v37, 4  ;;  %v2528_v45 = vld [vmem:[%s3198_s21 + $0x6c] sm:$0xe]  ;;  %v1735_v46 = vrot.slane %v3210_v41, 5  ;;  %v1738_v47 = vrot.slane %v3213_v42, 5  ;;  %v1025_v48 = vrot.slane %v1023_v39, 4 }
  0x8f   : > { %v1120_v49 = vsel %vm3204_vm13, %v2452_v40, %v1119_v37  ;;  %v2536_v50 = vrot.slane %v2528_v45, 9  ;;  %v828_v51 = vld [vmem:[%s3198_s21 + $0x54] sm:$0xf]  ;;  %v1021_v52 = vrot.slane %v1019_v43, 5  ;;  %v1031_v53 = vrot.slane %v1029_v34, 5  ;;  %v2664_v12 = vld [vmem:[%s3198_s21 + $0x6c] sm:$0xff] }
  0x90   : > { %v1123_v54 = vsel %vm3204_vm13, %v1121_v44, %v1122_v38  ;;  %v1826_v55 = vunpack.c.l.b16 %v1120_v49  ;;  %v1737_v56 = vrot.slane %v1735_v46, 4  ;;  %v1010_v57 = vshrl.u32 %v828_v51, 16  ;;  %v2469_v58 = vld [vmem:[%s3198_s21 + $0x60] sm:$0xf]  ;;  %v3227_v63 = vld [vmem:[%s3198_s21 + $0x64] sm:$0xf]  ;;  %2026 = vrot.lane.b32.xlu2 %v2664_v12, %s2847_s28 }
  0x91   : > { %v1827_v59 = vunpack.c.l.b16 %v1123_v54  ;;  %v1736_v60 = vsel %vm3204_vm13, %v2536_v50, %v1735_v46  ;;  %v1013_v61 = vshll.u32 %v828_v51, 16  ;;  %v1026_v62 = vor.u32 %v1025_v48, %v1021_v52  ;;  %v3238_v5 = vld [vmem:[%s3198_s21 + $0x68] sm:$0x1]  ;;  %v2511_v17 = vld [vmem:[%s3198_s21 + $0x6c] sm:$0xf] }
  0x92   : > { %v1739_v0 = vsel %vm3204_vm13, %v1737_v56, %v1738_v47  ;;  %v2082_v2 = vunpack.c.l.b16 %v1736_v60  ;;  %v1012_v4 = vrot.slane %v1010_v57, 4  ;;  %v1321_v6 = vshrl.u32 %v2469_v58, 16  ;;  %v1039_v10 = vld [vmem:[%s3198_s21 + $0x48] sm:$0xe]  ;;  %v3257_v38 = vld [vmem:[%s3198_s21 + $0x4c] sm:$0xf] }
  0x93   : > { %v1835_v7 = vpack.c.b16 %v1827_v59, %v1826_v55  ;;  %v2083_v8 = vunpack.c.l.b16 %v1739_v0  ;;  %v1015_v9 = vrot.slane %v1013_v61, 5  ;;  %v1027_v11 = vrot.slane %v1026_v62, 4  ;;  %v3260_v45 = vld [vmem:[%s3198_s21 + $0x50] sm:$0x1]  ;;  %v2485_v49 = vld [vmem:[%s3198_s21 + $0x54] sm:$0xe] }
  0x94   : > { %v1323_v13 = vrot.slane %v1321_v6, 4  ;;  %v1324_v14 = vshll.u32 %v2469_v58, 16  ;;  %v1330_v15 = vshll.u32 %v3227_v63, 16  ;;  %v1334_v16 = vshrl.u32 %v3227_v63, 16  ;;  %v3269_v57 = vld [vmem:[%s3198_s21 + $0x58] sm:$0xf] }
  0x95   : > { %1850 = vrot.lane.b32.xlu0 %v1835_v7, %s2846_s27  ;;  %v2091_v19 = vpack.c.b16 %v2083_v8, %v2082_v2  ;;  %v1016_v20 = vor.u32 %v1015_v9, %v1012_v4  ;;  %v1032_v21 = vsel %vm3233_vm14, %v1027_v11, %v1031_v53  ;;  %v1340_v22 = vshll.u32 %v3238_v5, 16  ;;  %v3272_v58 = vld [vmem:[%s3198_s21 + $0x5c] sm:$0x1]  ;;  %v2486_v0 = vld [vmem:[%s3198_s21 + $0x60] sm:$0xe] }
  0x96   : > { %v1787_v23 = vunpack.c.l.b16 %v1032_v21  ;;  %v1326_v24 = vrot.slane %v1324_v14, 5  ;;  %v1332_v25 = vrot.slane %v1330_v15, 5  ;;  %v1336_v26 = vrot.slane %v1334_v16, 4 }
  0x97   : > { %2106 = vrot.lane.b32.xlu1 %v2091_v19, %s2848_s29  ;;  %v1017_v27 = vrot.slane %v1016_v20, 4  ;;  %v1342_v28 = vrot.slane %v1340_v22, 5  ;;  %v1629_v29 = vshrl.u32 %v2511_v17, 16  ;;  %v1632_v30 = vshll.u32 %v2511_v17, 16  ;;  %v2527_v17 = vld [vmem:[%s3198_s21 + $0x60] sm:$0xe] }
  0x98   : > { %v1327_v31 = vor.u32 %v1326_v24, %v1323_v13  ;;  %v1337_v32 = vor.u32 %v1336_v26, %v1332_v25  ;;  %v1638_v33 = vshll.u32 %v3210_v41, 16  ;;  %v1642_v1 = vshrl.u32 %v3210_v41, 16  ;;  %v3297_v24 = vld [vmem:[%s3198_s21 + $0x68] sm:$0x1] }
  0x99   : > { %v1022_v18 = vsel %vm3233_vm14, %v1017_v27, %v1021_v52  ;;  %v1631_v34 = vrot.slane %v1629_v29, 4  ;;  %v1634_v35 = vrot.slane %v1632_v30, 5  ;;  %v1648_v37 = vshll.u32 %v3213_v42, 16  ;;  %v3303_v29 = vld [vmem:[%s3198_s21 + $0x40] sm:$0xf] }
  0x9a   : > { %v1786_v39 = vunpack.c.l.b16 %v1022_v18  ;;  %v1328_v40 = vrot.slane %v1327_v31, 4  ;;  %v1338_v43 = vrot.slane %v1337_v32, 4  ;;  %v1640_v44 = vrot.slane %v1638_v33, 5  ;;  %v2655_v33 = vld [vmem:[%s3198_s21 + $0x54] sm:$0xff] }
  0x9b   : > { %v1635_v41 = vor.u32 %v1634_v35, %v1631_v34  ;;  %v1644_v46 = vrot.slane %v1642_v1, 4  ;;  %v1650_v47 = vrot.slane %v1648_v37, 5  ;;  %v2451_v48 = vrot.slane %v1039_v10, 9  ;;  %v3314_v37 = vld [vmem:[%s3198_s21 + $0x44] sm:$0x1] }
  0x9c   : > { %v1795_v50 = vpack.c.b16 %v1787_v23, %v1786_v39  ;;  %v1333_v42 = vsel %vm3233_vm14, %v1328_v40, %v1332_v25  ;;  %v1343_v51 = vsel %vm3233_vm14, %v1338_v43, %v1342_v28  ;;  %v1112_v52 = vrot.slane %v3257_v38, 5  ;;  %v3294_v23 = vld [vmem:[%s3198_s21 + $0x64] sm:$0xf]  ;;  %v824_v28 = vld [vmem:[%s3198_s21 + $0x3c] sm:$0xf] }
  0x9d   : > { %v1914_v53 = vunpack.c.l.b16 %v1333_v42  ;;  %v1915_v54 = vunpack.c.l.b16 %v1343_v51  ;;  %v1636_v55 = vrot.slane %v1635_v41, 4  ;;  %v1645_v56 = vor.u32 %v1644_v46, %v1640_v44 }
  0x9e   : > { %1810 = vrot.lane.b32.xlu0 %v1795_v50, %s2849_s6  ;;  %v1113_v59 = vsel %vm3204_vm13, %v2451_v48, %v1112_v52  ;;  %v1114_v60 = vrot.slane %v1112_v52, 4  ;;  %v1115_v61 = vrot.slane %v3260_v45, 5  ;;  %v2493_v62 = vrot.slane %v2485_v49, 9  ;;  %v826_v48 = vld [vmem:[%s3198_s21 + $0x48] sm:$0xf] }
  0x9f   : > { %v1923_v2 = vpack.c.b16 %v1915_v54, %v1914_v53  ;;  %v1641_v4 = vsel %vm3233_vm14, %v1636_v55, %v1640_v44  ;;  %v1646_v6 = vrot.slane %v1645_v56, 4  ;;  %v1824_v7 = vunpack.c.l.b16 %v1113_v59 }
  0xa0   : > { %v2042_v8 = vunpack.c.l.b16 %v1641_v4  ;;  %v1116_v9 = vsel %vm3204_vm13, %v1114_v60, %v1115_v61  ;;  %v1420_v11 = vrot.slane %v3269_v57, 5  ;;  %v1423_v12 = vrot.slane %v3272_v58, 5 }
  0xa1   : > { %1938 = vrot.lane.b32.xlu1 %v1923_v2, %s2850_s7  ;;  %v1651_v13 = vsel %vm3233_vm14, %v1646_v6, %v1650_v47  ;;  %v1825_v14 = vunpack.c.l.b16 %v1116_v9  ;;  %v2494_v15 = vrot.slane %v2486_v0, 9  ;;  %v1427_v16 = vrot.slane %v3227_v63, 5  ;;  %v2465_v6 = vld [vmem:[%s3198_s21 + $0x48] sm:$0xf] }
  0xa2   : > { %v2043_v19 = vunpack.c.l.b16 %v1651_v13  ;;  %v1421_v20 = vsel %vm3204_vm13, %v2493_v62, %v1420_v11  ;;  %v1422_v21 = vrot.slane %v1420_v11, 4  ;;  %v1430_v22 = vrot.slane %v3238_v5, 5 }
  0xa3   : > { %v1834_v25 = vpack.c.b16 %v1825_v14, %v1824_v7  ;;  %v1952_v26 = vunpack.c.l.b16 %v1421_v20  ;;  %v1428_v27 = vsel %vm3204_vm13, %v2494_v15, %v1427_v16  ;;  %v1429_v63 = vrot.slane %v1427_v16, 4  ;;  %v3342_v20 = vld [vmem:[%s3198_s21 + $0x50] sm:$0x1] }
  0xa4   : > { %v2051_v30 = vpack.c.b16 %v2043_v19, %v2042_v8  ;;  %v1424_v31 = vsel %vm3204_vm13, %v1422_v21, %v1423_v12  ;;  %v1954_v32 = vunpack.c.l.b16 %v1428_v27  ;;  %v2535_v5 = vrot.slane %v2527_v17, 9  ;;  %v2663_v12 = vld [vmem:[%s3198_s21 + $0x60] sm:$0xff] }
  0xa5   : > { %v1953_v1 = vunpack.c.l.b16 %v1424_v31  ;;  %v1431_v10 = vsel %vm3204_vm13, %v1429_v63, %v1430_v22  ;;  %v1728_v18 = vrot.slane %v3294_v23, 5  ;;  %v1731_v34 = vrot.slane %v3297_v24, 5 }
  0xa6   : > { %2066 = vrot.lane.b32.xlu0 %v2051_v30, %s2851_s8  ;;  %v1955_v35 = vunpack.c.l.b16 %v1431_v10  ;;  %v962_v39 = vshrl.u32 %v824_v28, 16  ;;  %v965_v40 = vshll.u32 %v824_v28, 16  ;;  %v971_v43 = vshll.u32 %v3303_v29, 16  ;;  %v2467_v30 = vld [vmem:[%s3198_s21 + $0x54] sm:$0xf] }
  0xa7   : > { %v3317_v44 = vpack.c.b16 %v1953_v1, %v1952_v26  ;;  %v1729_v41 = vsel %vm3204_vm13, %v2535_v5, %v1728_v18  ;;  %v1730_v46 = vrot.slane %v1728_v18, 4  ;;  %v975_v47 = vshrl.u32 %v3303_v29, 16 }
  0xa8   : > { %v1963_v49 = vpack.c.b16 %v1955_v35, %v1954_v32  ;;  %v2080_v50 = vunpack.c.l.b16 %v1729_v41  ;;  %v964_v42 = vrot.slane %v962_v39, 4  ;;  %v967_v51 = vrot.slane %v965_v40, 5 }
  0xa9   : > { %1896 = vrot.lane.b32.xlu1 %v2655_v33, %s2845_s24  ;;  %v1732_v52 = vsel %vm3204_vm13, %v1730_v46, %v1731_v34  ;;  %v973_v53 = vrot.slane %v971_v43, 5  ;;  %v977_v54 = vrot.slane %v975_v47, 4  ;;  %v981_v55 = vshll.u32 %v3314_v37, 16  ;;  %v2507_v47 = vld [vmem:[%s3198_s21 + $0x54] sm:$0xf] }
  0xaa   : > { %1978 = vrot.lane.b32.xlu2 %v1963_v49, %s2852_s9  ;;  %v2081_v56 = vunpack.c.l.b16 %v1732_v52  ;;  %v968_v59 = vor.u32 %v967_v51, %v964_v42  ;;  %v986_v60 = vshrl.u32 %v826_v48, 16  ;;  %v989_v61 = vshll.u32 %v826_v48, 16 }
  0xab   : > { %v978_v62 = vor.u32 %v977_v54, %v973_v53  ;;  %v983_v0 = vrot.slane %v981_v55, 5  ;;  %v995_v2 = vshll.u32 %v3257_v38, 16  ;;  %v999_v4 = vshrl.u32 %v3257_v38, 16  ;;  %v3339_v38 = vld [vmem:[%s3198_s21 + $0x4c] sm:$0xf] }
  0xac   : > { %v3331_v7 = vpack.c.b16 %v2081_v56, %v2080_v50  ;;  %v969_v8 = vrot.slane %v968_v59, 4  ;;  %v988_v9 = vrot.slane %v986_v60, 4  ;;  %v991_v11 = vrot.slane %v989_v61, 5  ;;  %v3364_v60 = vld [vmem:[%s3198_s21 + $0x58] sm:$0xf] }
  0xad   : > { %v979_v13 = vrot.slane %v978_v62, 4  ;;  %v997_v14 = vrot.slane %v995_v2, 5  ;;  %v1001_v15 = vrot.slane %v999_v4, 4  ;;  %v1005_v16 = vshll.u32 %v3260_v45, 16 }
  0xae   : > { %1848 = vrot.lane.b32.xlu0 %v1834_v25, %s2846_s27  ;;  %v974_v17 = vsel %vm3233_vm14, %v969_v8, %v973_v53  ;;  %v992_v19 = vor.u32 %v991_v11, %v988_v9  ;;  %v1273_v21 = vshrl.u32 %v2465_v6, 16  ;;  %v1276_v22 = vshll.u32 %v2465_v6, 16  ;;  %v3367_v6 = vld [vmem:[%s3198_s21 + $0x5c] sm:$0x1]  ;;  %v2509_v11 = vld [vmem:[%s3198_s21 + $0x60] sm:$0xf] }
  0xaf   : > { %v984_v26 = vsel %vm3233_vm14, %v979_v13, %v983_v0  ;;  %v1782_v27 = vunpack.c.l.b16 %v974_v17  ;;  %v1002_v63 = vor.u32 %v1001_v15, %v997_v14  ;;  %v1007_v28 = vrot.slane %v1005_v16, 5 }
  0xb0   : > { %v1783_v45 = vunpack.c.l.b16 %v984_v26  ;;  %v993_v31 = vrot.slane %v992_v19, 4  ;;  %v1275_v25 = vrot.slane %v1273_v21, 4  ;;  %v1278_v32 = vrot.slane %v1276_v22, 5 }
  0xb1   : > { %2024 = vrot.lane.b32.xlu1 %v2663_v12, %s2847_s28  ;;  %v1003_v5 = vrot.slane %v1002_v63, 4  ;;  %v1282_v33 = vshll.u32 %v3339_v38, 16  ;;  %v1286_v1 = vshrl.u32 %v3339_v38, 16  ;;  %v1292_v10 = vshll.u32 %v3342_v20, 16 }
  0xb2   : > { %v1793_v18 = vpack.c.b16 %v1783_v45, %v1782_v27  ;;  %v998_v34 = vsel %vm3233_vm14, %v993_v31, %v997_v14  ;;  %v1279_v35 = vor.u32 %v1278_v32, %v1275_v25  ;;  %v1297_v39 = vshrl.u32 %v2467_v30, 16 }
  0xb3   : > { %v1008_v40 = vsel %vm3233_vm14, %v1003_v5, %v1007_v28  ;;  %v1784_v43 = vunpack.c.l.b16 %v998_v34  ;;  %v1284_v41 = vrot.slane %v1282_v33, 5  ;;  %v1288_v46 = vrot.slane %v1286_v1, 4  ;;  %v822_v33 = vld [vmem:[%s3198_s21 + $0x30] sm:$0xf] }
  0xb4   : > { %v1785_v48 = vunpack.c.l.b16 %v1008_v40  ;;  %v1280_v49 = vrot.slane %v1279_v35, 4  ;;  %v1294_v50 = vrot.slane %v1292_v10, 5  ;;  %v1299_v42 = vrot.slane %v1297_v39, 4 }
  0xb5   : > { %v1289_v51 = vor.u32 %v1288_v46, %v1284_v41  ;;  %v1300_v52 = vshll.u32 %v2467_v30, 16  ;;  %v1306_v53 = vshll.u32 %v3269_v57, 16  ;;  %v1310_v54 = vshrl.u32 %v3269_v57, 16 }
  0xb6   : > { %1976 = vrot.lane.b32.xlu0 %v3317_v44, %s2852_s9  ;;  %v1794_v55 = vpack.c.b16 %v1785_v48, %v1784_v43  ;;  %v1285_v56 = vsel %vm3233_vm14, %v1280_v49, %v1284_v41  ;;  %v1316_v59 = vshll.u32 %v3272_v58, 16  ;;  %v1581_v61 = vshrl.u32 %v2507_v47, 16 }
  0xb7   : > { %v1290_v62 = vrot.slane %v1289_v51, 4  ;;  %v1910_v0 = vunpack.c.l.b16 %v1285_v56  ;;  %v1302_v2 = vrot.slane %v1300_v52, 5  ;;  %v1308_v4 = vrot.slane %v1306_v53, 5  ;;  %v834_v52 = vld [vmem:[%s3198_s21 + $0x38] sm:$0x1] }
  0xb8   : > { %1808 = vrot.lane.b32.xlu2 %v1794_v55, %s2849_s6  ;;  %v1312_v57 = vrot.slane %v1310_v54, 4  ;;  %v1318_v44 = vrot.slane %v1316_v59, 5  ;;  %v1583_v8 = vrot.slane %v1581_v61, 4  ;;  %v1584_v9 = vshll.u32 %v2507_v47, 16  ;;  %v823_v47 = vld [vmem:[%s3198_s21 + $0x34] sm:$0xf] }
  0xb9   : > { %1806 = vrot.lane.b32.xlu1 %v1793_v18, %s2849_s6  ;;  %v1295_v58 = vsel %vm3233_vm14, %v1290_v62, %v1294_v50  ;;  %v1303_v12 = vor.u32 %v1302_v2, %v1299_v42  ;;  %v1590_v13 = vshll.u32 %v3364_v60, 16  ;;  %v1594_v14 = vshrl.u32 %v3364_v60, 16  ;;  %v1037_v53 = vld [vmem:[%s3198_s21 + $0x30] sm:$0xe] }
  0xba   : > { %v1911_v15 = vunpack.c.l.b16 %v1295_v58  ;;  %v1313_v16 = vor.u32 %v1312_v57, %v1308_v4  ;;  %v1586_v17 = vrot.slane %v1584_v9, 5  ;;  %v1600_v19 = vshll.u32 %v3367_v6, 16 }
  0xbb   : > { %v1304_v21 = vrot.slane %v1303_v12, 4  ;;  %v1592_v22 = vrot.slane %v1590_v13, 5  ;;  %v1596_v26 = vrot.slane %v1594_v14, 4  ;;  %v1605_v27 = vshrl.u32 %v2509_v11, 16 }
  0xbc   : > { %v1921_v63 = vpack.c.b16 %v1911_v15, %v1910_v0  ;;  %v1314_v28 = vrot.slane %v1313_v16, 4  ;;  %v1587_v30 = vor.u32 %v1586_v17, %v1583_v8  ;;  %v1602_v45 = vrot.slane %v1600_v19, 5  ;;  %v1038_v8 = vld [vmem:[%s3198_s21 + $0x3c] sm:$0xe] }
  0xbd   : > { %v1309_v31 = vsel %vm3233_vm14, %v1304_v21, %v1308_v4  ;;  %v1597_v25 = vor.u32 %v1596_v26, %v1592_v22  ;;  %v1607_v32 = vrot.slane %v1605_v27, 4  ;;  %v1608_v5 = vshll.u32 %v2509_v11, 16 }
  0xbe   : > { %2104 = vrot.lane.b32.xlu0 %v3331_v7, %s2848_s29  ;;  %v1319_v1 = vsel %vm3233_vm14, %v1314_v28, %v1318_v44  ;;  %v1912_v10 = vunpack.c.l.b16 %v1309_v31  ;;  %v1588_v18 = vrot.slane %v1587_v30, 4  ;;  %v1614_v34 = vshll.u32 %v3294_v23, 16 }
  0xbf   : > { %v1913_v35 = vunpack.c.l.b16 %v1319_v1  ;;  %v1598_v39 = vrot.slane %v1597_v25, 4  ;;  %v1610_v40 = vrot.slane %v1608_v5, 5  ;;  %v1618_v43 = vshrl.u32 %v3294_v23, 16  ;;  %v2654_v23 = vld [vmem:[%s3198_s21 + $0x48] sm:$0xff] }
  0xc0   : > { %v1593_v41 = vsel %vm3233_vm14, %v1588_v18, %v1592_v22  ;;  %v1616_v46 = vrot.slane %v1614_v34, 5  ;;  %v1624_v7 = vshll.u32 %v3297_v24, 16  ;;  %v938_v48 = vshrl.u32 %v822_v33, 16 }
  0xc1   : > { %1934 = vrot.lane.b32.xlu1 %v1921_v63, %s2850_s7  ;;  %v1922_v49 = vpack.c.b16 %v1913_v35, %v1912_v10  ;;  %v1603_v50 = vsel %vm3233_vm14, %v1598_v39, %v1602_v45  ;;  %v2038_v42 = vunpack.c.l.b16 %v1593_v41  ;;  %v1611_v51 = vor.u32 %v1610_v40, %v1607_v32  ;;  %v2662_v32 = vld [vmem:[%s3198_s21 + $0x54] sm:$0xff]  ;;  %v2464_v40 = vld [vmem:[%s3198_s21 + $0x40] sm:$0xf] }
  0xc2   : > { %v2039_v54 = vunpack.c.l.b16 %v1603_v50  ;;  %v1620_v55 = vrot.slane %v1618_v43, 4  ;;  %v1626_v56 = vrot.slane %v1624_v7, 5  ;;  %v940_v59 = vrot.slane %v938_v48, 4  ;;  %v2475_v43 = vld [vmem:[%s3198_s21 + $0x44] sm:$0x1] }
  0xc3   : > { %1936 = vrot.lane.b32.xlu2 %v1922_v49, %s2850_s7  ;;  %v1612_v24 = vrot.slane %v1611_v51, 4  ;;  %v941_v61 = vshll.u32 %v822_v33, 16  ;;  %v947_v62 = vshll.u32 %v823_v47, 16  ;;  %v951_v0 = vshrl.u32 %v823_v47, 16  ;;  %v2483_v48 = vld [vmem:[%s3198_s21 + $0x3c] sm:$0xe] }
  0xc4   : > { %v2049_v2 = vpack.c.b16 %v2039_v54, %v2038_v42  ;;  %v1621_v4 = vor.u32 %v1620_v55, %v1616_v46  ;;  %v957_v57 = vshll.u32 %v834_v52, 16  ;;  %v2449_v44 = vrot.slane %v1037_v53, 9  ;;  %v2484_v54 = vld [vmem:[%s3198_s21 + $0x48] sm:$0xe] }
  0xc5   : > { %v1617_v9 = vsel %vm3233_vm14, %v1612_v24, %v1616_v46  ;;  %v943_v11 = vrot.slane %v941_v61, 5  ;;  %v949_v58 = vrot.slane %v947_v62, 5  ;;  %v953_v12 = vrot.slane %v951_v0, 4 }
  0xc6   : > { %1894 = vrot.lane.b32.xlu0 %v2654_v23, %s2845_s24  ;;  %v1622_v13 = vrot.slane %v1621_v4, 4  ;;  %v2040_v14 = vunpack.c.l.b16 %v1617_v9  ;;  %v959_v15 = vrot.slane %v957_v57, 5  ;;  %v1098_v16 = vrot.slane %v823_v47, 5  ;;  %v2505_v9 = vld [vmem:[%s3198_s21 + $0x48] sm:$0xf] }
  0xc7   : > { %v944_v17 = vor.u32 %v943_v11, %v940_v59  ;;  %v954_v19 = vor.u32 %v953_v12, %v949_v58  ;;  %v1101_v21 = vrot.slane %v834_v52, 5  ;;  %v2450_v22 = vrot.slane %v1038_v8, 9 }
  0xc8   : > { %v1627_v26 = vsel %vm3233_vm14, %v1622_v13, %v1626_v56  ;;  %v1099_v27 = vsel %vm3204_vm13, %v2449_v44, %v1098_v16  ;;  %v1100_v63 = vrot.slane %v1098_v16, 4  ;;  %v1105_v28 = vrot.slane %v3303_v29, 5  ;;  %v2463_v29 = vld [vmem:[%s3198_s21 + $0x3c] sm:$0xf] }
  0xc9   : > { %2062 = vrot.lane.b32.xlu1 %v2049_v2, %s2851_s8  ;;  %v2041_v30 = vunpack.c.l.b16 %v1627_v26  ;;  %v945_v45 = vrot.slane %v944_v17, 4  ;;  %v955_v31 = vrot.slane %v954_v19, 4  ;;  %v1820_v25 = vunpack.c.l.b16 %v1099_v27 }
  0xca   : > { %v1102_v5 = vsel %vm3204_vm13, %v1100_v63, %v1101_v21  ;;  %v1106_v33 = vsel %vm3204_vm13, %v2450_v22, %v1105_v28  ;;  %v1107_v1 = vrot.slane %v1105_v28, 4  ;;  %v1108_v10 = vrot.slane %v3314_v37, 5  ;;  %v2506_v22 = vld [vmem:[%s3198_s21 + $0x4c] sm:$0xf]  ;;  %v2517_v28 = vld [vmem:[%s3198_s21 + $0x50] sm:$0x1] }
  0xcb   : > { %v2050_v18 = vpack.c.b16 %v2041_v30, %v2040_v14  ;;  %v950_v34 = vsel %vm3233_vm14, %v945_v45, %v949_v58  ;;  %v960_v35 = vsel %vm3233_vm14, %v955_v31, %v959_v15  ;;  %v1821_v39 = vunpack.c.l.b16 %v1102_v5  ;;  %v2525_v45 = vld [vmem:[%s3198_s21 + $0x48] sm:$0xe] }
  0xcc   : > { %v1780_v41 = vunpack.c.l.b16 %v950_v34  ;;  %v1781_v46 = vunpack.c.l.b16 %v960_v35  ;;  %v1109_v7 = vsel %vm3204_vm13, %v1107_v1, %v1108_v10  ;;  %v1822_v47 = vunpack.c.l.b16 %v1106_v33 }
  0xcd   : > { %2064 = vrot.lane.b32.xlu2 %v2050_v18, %s2851_s8  ;;  %v1832_v37 = vpack.c.b16 %v1821_v39, %v1820_v25  ;;  %v1823_v49 = vunpack.c.l.b16 %v1109_v7  ;;  %v1249_v50 = vshrl.u32 %v2463_v29, 16  ;;  %v1252_v42 = vshll.u32 %v2463_v29, 16  ;;  %v2526_v18 = vld [vmem:[%s3198_s21 + $0x54] sm:$0xe] }
  0xce   : > { %2022 = vrot.lane.b32.xlu0 %v2662_v32, %s2847_s28  ;;  %v1792_v51 = vpack.c.b16 %v1781_v46, %v1780_v41  ;;  %v1258_v52 = vshll.u32 %v2464_v40, 16  ;;  %v1262_v53 = vshrl.u32 %v2464_v40, 16  ;;  %v1268_v23 = vshll.u32 %v2475_v43, 16 }
  0xcf   : > { %v1833_v55 = vpack.c.b16 %v1823_v49, %v1822_v47  ;;  %v1251_v56 = vrot.slane %v1249_v50, 4  ;;  %v1254_v59 = vrot.slane %v1252_v42, 5  ;;  %v2491_v24 = vrot.slane %v2483_v48, 9  ;;  %v1036_v47 = vld [vmem:[%s3198_s21 + $0x24] sm:$0xe] }
  0xd0   : > { %v1260_v61 = vrot.slane %v1258_v52, 5  ;;  %v1264_v62 = vrot.slane %v1262_v53, 4  ;;  %v1270_v0 = vrot.slane %v1268_v23, 5  ;;  %v1406_v2 = vrot.slane %v2464_v40, 5  ;;  %v3454_v23 = vld [vmem:[%s3198_s21 + $0x28] sm:$0xf] }
  0xd1   : > { %1844 = vrot.lane.b32.xlu1 %v1832_v37, %s2846_s27  ;;  %v1255_v4 = vor.u32 %v1254_v59, %v1251_v56  ;;  %v1409_v57 = vrot.slane %v2475_v43, 5  ;;  %v2492_v44 = vrot.slane %v2484_v54, 9  ;;  %v1413_v8 = vrot.slane %v3339_v38, 5  ;;  %v3458_v59 = vld [vmem:[%s3198_s21 + $0x2c] sm:$0x1] }
  0xd2   : > { %v1265_v11 = vor.u32 %v1264_v62, %v1260_v61  ;;  %v1407_v58 = vsel %vm3204_vm13, %v2491_v24, %v1406_v2  ;;  %v1408_v12 = vrot.slane %v1406_v2, 4  ;;  %v1416_v13 = vrot.slane %v3342_v20, 5 }
  0xd3   : > { %v1256_v14 = vrot.slane %v1255_v4, 4  ;;  %v1948_v15 = vunpack.c.l.b16 %v1407_v58  ;;  %v1414_v16 = vsel %vm3204_vm13, %v2492_v44, %v1413_v8  ;;  %v1415_v17 = vrot.slane %v1413_v8, 4  ;;  %v3469_v4 = vld [vmem:[%s3198_s21 + $0x34] sm:$0xf] }
  0xd4   : > { %v1266_v19 = vrot.slane %v1265_v11, 4  ;;  %v1410_v38 = vsel %vm3204_vm13, %v1408_v12, %v1409_v57  ;;  %v1950_v21 = vunpack.c.l.b16 %v1414_v16  ;;  %v1557_v26 = vshrl.u32 %v2505_v9, 16 }
  0xd5   : > { %1846 = vrot.lane.b32.xlu2 %v1833_v55, %s2846_s27  ;;  %v1261_v20 = vsel %vm3233_vm14, %v1256_v14, %v1260_v61  ;;  %v1949_v27 = vunpack.c.l.b16 %v1410_v38  ;;  %v1417_v63 = vsel %vm3204_vm13, %v1415_v17, %v1416_v13  ;;  %v1560_v30 = vshll.u32 %v2505_v9, 16  ;;  %v2482_v61 = vld [vmem:[%s3198_s21 + $0x30] sm:$0xe]  ;;  %v3473_v9 = vld [vmem:[%s3198_s21 + $0x38] sm:$0x1] }
  0xd6   : > { %1804 = vrot.lane.b32.xlu0 %v1792_v51, %s2849_s6  ;;  %v1271_v31 = vsel %vm3233_vm14, %v1266_v19, %v1270_v0  ;;  %v1908_v25 = vunpack.c.l.b16 %v1261_v20  ;;  %v1951_v32 = vunpack.c.l.b16 %v1417_v63  ;;  %v1559_v5 = vrot.slane %v1557_v26, 4  ;;  %v2524_v19 = vld [vmem:[%s3198_s21 + $0x3c] sm:$0xe]  ;;  %v3487_v20 = vld [vmem:[%s3198_s21 + $0x40] sm:$0xf] }
  0xd7   : > { %v1909_v33 = vunpack.c.l.b16 %v1271_v31  ;;  %v1960_v1 = vpack.c.b16 %v1949_v27, %v1948_v15  ;;  %v1562_v10 = vrot.slane %v1560_v30, 5  ;;  %v1566_v29 = vshll.u32 %v2506_v22, 16  ;;  %v3490_v27 = vld [vmem:[%s3198_s21 + $0x44] sm:$0x1]  ;;  %v818_v31 = vld [vmem:[%s3198_s21 + $0x18] sm:$0xf] }
  0xd8   : > { %v1961_v34 = vpack.c.b16 %v1951_v32, %v1950_v21  ;;  %v1570_v35 = vshrl.u32 %v2506_v22, 16  ;;  %v1576_v39 = vshll.u32 %v2517_v28, 16  ;;  %v2533_v40 = vrot.slane %v2525_v45, 9 }
  0xd9   : > { %v1920_v43 = vpack.c.b16 %v1909_v33, %v1908_v25  ;;  %1972 = vrot.lane.b32.xlu1 %v1960_v1, %s2852_s9  ;;  %v1563_v41 = vor.u32 %v1562_v10, %v1559_v5  ;;  %v1568_v46 = vrot.slane %v1566_v29, 5  ;;  %v1714_v7 = vrot.slane %v2506_v22, 5  ;;  %v3497_v25 = vld [vmem:[%s3198_s21 + $0x1c] sm:$0xf] }
  0xda   : > { %v1572_v48 = vrot.slane %v1570_v35, 4  ;;  %v1578_v37 = vrot.slane %v1576_v39, 5  ;;  %v1717_v49 = vrot.slane %v2517_v28, 5  ;;  %v2534_v50 = vrot.slane %v2526_v18, 9  ;;  %v3507_v39 = vld [vmem:[%s3198_s21 + $0x20] sm:$0x1] }
  0xdb   : > { %v1564_v42 = vrot.slane %v1563_v41, 4  ;;  %v1715_v51 = vsel %vm3204_vm13, %v2533_v40, %v1714_v7  ;;  %v1716_v52 = vrot.slane %v1714_v7, 4  ;;  %v1721_v53 = vrot.slane %v3364_v60, 5 }
  0xdc   : > { %v1573_v54 = vor.u32 %v1572_v48, %v1568_v46  ;;  %v2076_v55 = vunpack.c.l.b16 %v1715_v51  ;;  %v1724_v56 = vrot.slane %v3367_v6, 5  ;;  %v2448_v24 = vrot.slane %v1036_v47, 9 }
  0xdd   : > { %1974 = vrot.lane.b32.xlu2 %v1961_v34, %s2852_s9  ;;  %v1569_v62 = vsel %vm3233_vm14, %v1564_v42, %v1568_v46  ;;  %v1718_v0 = vsel %vm3204_vm13, %v1716_v52, %v1717_v49  ;;  %v1722_v60 = vsel %vm3204_vm13, %v2534_v50, %v1721_v53  ;;  %v1723_v2 = vrot.slane %v1721_v53, 4  ;;  %v2652_v46 = vld [vmem:[%s3198_s21 + $0x30] sm:$0xff] }
  0xde   : > { %1932 = vrot.lane.b32.xlu0 %v1920_v43, %s2850_s7  ;;  %v1574_v6 = vrot.slane %v1573_v54, 4  ;;  %v2036_v57 = vunpack.c.l.b16 %v1569_v62  ;;  %v2077_v44 = vunpack.c.l.b16 %v1718_v0  ;;  %v2078_v8 = vunpack.c.l.b16 %v1722_v60 }
  0xdf   : > { %v1725_v11 = vsel %vm3204_vm13, %v1723_v2, %v1724_v56  ;;  %v1091_v58 = vrot.slane %v3454_v23, 5  ;;  %v1094_v12 = vrot.slane %v3458_v59, 5  ;;  %v2490_v13 = vrot.slane %v2482_v61, 9  ;;  %v2653_v56 = vld [vmem:[%s3198_s21 + $0x3c] sm:$0xff] }
  0xe0   : > { %v1579_v14 = vsel %vm3233_vm14, %v1574_v6, %v1578_v37  ;;  %v2088_v15 = vpack.c.b16 %v2077_v44, %v2076_v55  ;;  %v2079_v16 = vunpack.c.l.b16 %v1725_v11  ;;  %v1399_v17 = vrot.slane %v3469_v4, 5  ;;  %v820_v37 = vld [vmem:[%s3198_s21 + $0x24] sm:$0xf] }
  0xe1   : > { %v2037_v38 = vunpack.c.l.b16 %v1579_v14  ;;  %v1092_v21 = vsel %vm3204_vm13, %v2448_v24, %v1091_v58  ;;  %v1093_v22 = vrot.slane %v1091_v58, 4  ;;  %v1402_v26 = vrot.slane %v3473_v9, 5  ;;  %v2459_v44 = vld [vmem:[%s3198_s21 + $0x24] sm:$0xf] }
  0xe2   : > { %2100 = vrot.lane.b32.xlu1 %v2088_v15, %s2848_s29  ;;  %v2089_v63 = vpack.c.b16 %v2079_v16, %v2078_v8  ;;  %v1818_v28 = vunpack.c.l.b16 %v1092_v21  ;;  %v1400_v30 = vsel %vm3204_vm13, %v2490_v13, %v1399_v17  ;;  %v1401_v45 = vrot.slane %v1399_v17, 4 }
  0xe3   : > { %v2048_v32 = vpack.c.b16 %v2037_v38, %v2036_v57  ;;  %v1095_v5 = vsel %vm3204_vm13, %v1093_v22, %v1094_v12  ;;  %v1946_v33 = vunpack.c.l.b16 %v1400_v30  ;;  %v2532_v1 = vrot.slane %v2524_v19, 9  ;;  %v3540_v38 = vld [vmem:[%s3198_s21 + $0x2c] sm:$0x1] }
  0xe4   : > { %v1819_v10 = vunpack.c.l.b16 %v1095_v5  ;;  %v1403_v29 = vsel %vm3204_vm13, %v1401_v45, %v1402_v26  ;;  %v1707_v18 = vrot.slane %v3487_v20, 5  ;;  %v1710_v34 = vrot.slane %v3490_v27, 5  ;;  %v2660_v26 = vld [vmem:[%s3198_s21 + $0x3c] sm:$0xff]  ;;  %v2461_v45 = vld [vmem:[%s3198_s21 + $0x30] sm:$0xf] }
  0xe5   : > { %2102 = vrot.lane.b32.xlu2 %v2089_v63, %s2848_s29  ;;  %v1947_v35 = vunpack.c.l.b16 %v1403_v29  ;;  %v890_v40 = vshrl.u32 %v818_v31, 16  ;;  %v893_v43 = vshll.u32 %v818_v31, 16  ;;  %v899_v41 = vshll.u32 %v3497_v25, 16 }
  0xe6   : > { %2060 = vrot.lane.b32.xlu0 %v2048_v32, %s2851_s8  ;;  %v3514_v7 = vsel %vm3204_vm13, %v2532_v1, %v1707_v18  ;;  %v1709_v47 = vrot.slane %v1707_v18, 4  ;;  %v903_v48 = vshrl.u32 %v3497_v25, 16  ;;  %v1831_v49 = vpack.c.b16 %v1819_v10, %v1818_v28 }
  0xe7   : > { %v3518_v50 = vpack.c.b16 %v1947_v35, %v1946_v33  ;;  %v892_v42 = vrot.slane %v890_v40, 4  ;;  %v895_v51 = vrot.slane %v893_v43, 5  ;;  %v901_v53 = vrot.slane %v899_v41, 5 }
  0xe8   : > { %v3522_v52 = vsel %vm3204_vm13, %v1709_v47, %v1710_v34  ;;  %v905_v54 = vrot.slane %v903_v48, 4  ;;  %v909_v55 = vshll.u32 %v3507_v39, 16  ;;  %v2074_v24 = vunpack.c.l.b16 %v3514_v7  ;;  %v2661_v34 = vld [vmem:[%s3198_s21 + $0x48] sm:$0xff] }
  0xe9   : > { %v896_v61 = vor.u32 %v895_v51, %v892_v42  ;;  %v914_v62 = vshrl.u32 %v820_v37, 16  ;;  %v917_v0 = vshll.u32 %v820_v37, 16  ;;  %v923_v6 = vshll.u32 %v3454_v23, 16 }
  0xea   : > { %1890 = vrot.lane.b32.xlu1 %v2652_v46, %s2845_s24  ;;  %v906_v60 = vor.u32 %v905_v54, %v901_v53  ;;  %v911_v2 = vrot.slane %v909_v55, 5  ;;  %v927_v57 = vshrl.u32 %v3454_v23, 16  ;;  %v2075_v8 = vunpack.c.l.b16 %v3522_v52  ;;  %v3537_v23 = vld [vmem:[%s3198_s21 + $0x28] sm:$0xf] }
  0xeb   : > { %v897_v11 = vrot.slane %v896_v61, 4  ;;  %v916_v58 = vrot.slane %v914_v62, 4  ;;  %v919_v12 = vrot.slane %v917_v0, 5  ;;  %v925_v14 = vrot.slane %v923_v6, 5  ;;  %v3564_v6 = vld [vmem:[%s3198_s21 + $0x34] sm:$0xf] }
  0xec   : > { %v907_v13 = vrot.slane %v906_v60, 4  ;;  %v929_v15 = vrot.slane %v927_v57, 4  ;;  %v933_v16 = vshll.u32 %v3458_v59, 16  ;;  %v1201_v21 = vshrl.u32 %v2459_v44, 16 }
  0xed   : > { %1892 = vrot.lane.b32.xlu2 %v2653_v56, %s2845_s24  ;;  %v902_v17 = vsel %vm3233_vm14, %v897_v11, %v901_v53  ;;  %v920_v19 = vor.u32 %v919_v12, %v916_v58  ;;  %v1204_v22 = vshll.u32 %v2459_v44, 16  ;;  %v1210_v10 = vshll.u32 %v3537_v23, 16 }
  0xee   : > { %1842 = vrot.lane.b32.xlu0 %v1831_v49, %s2846_s27  ;;  %v912_v63 = vsel %vm3233_vm14, %v907_v13, %v911_v2  ;;  %v1776_v59 = vunpack.c.l.b16 %v902_v17  ;;  %v930_v28 = vor.u32 %v929_v15, %v925_v14  ;;  %v935_v30 = vrot.slane %v933_v16, 5  ;;  %v2501_v49 = vld [vmem:[%s3198_s21 + $0x30] sm:$0xf] }
  0xef   : > { %v1777_v31 = vunpack.c.l.b16 %v912_v63  ;;  %v921_v32 = vrot.slane %v920_v19, 4  ;;  %v1203_v5 = vrot.slane %v1201_v21, 4  ;;  %v1206_v33 = vrot.slane %v1204_v22, 5 }
  0xf0   : > { %v931_v1 = vrot.slane %v930_v28, 4  ;;  %v1214_v29 = vshrl.u32 %v3537_v23, 16  ;;  %v1220_v18 = vshll.u32 %v3540_v38, 16  ;;  %v1225_v41 = vshrl.u32 %v2461_v45, 16 }
  0xf1   : > { %v1790_v35 = vpack.c.b16 %v1777_v31, %v1776_v59  ;;  %v926_v40 = vsel %vm3233_vm14, %v921_v32, %v925_v14  ;;  %v1207_v43 = vor.u32 %v1206_v33, %v1203_v5  ;;  %v1212_v48 = vrot.slane %v1210_v10, 5  ;;  %v2503_v59 = vld [vmem:[%s3198_s21 + $0x3c] sm:$0xf] }
  0xf2   : > { %2018 = vrot.lane.b32.xlu1 %v2660_v26, %s2847_s28  ;;  %v936_v46 = vsel %vm3233_vm14, %v931_v1, %v935_v30  ;;  %v1778_v47 = vunpack.c.l.b16 %v926_v40  ;;  %v1216_v37 = vrot.slane %v1214_v29, 4  ;;  %v1222_v53 = vrot.slane %v1220_v18, 5 }
  0xf3   : > { %v1779_v42 = vunpack.c.l.b16 %v936_v46  ;;  %v1208_v51 = vrot.slane %v1207_v43, 4  ;;  %v1227_v54 = vrot.slane %v1225_v41, 4  ;;  %v1228_v56 = vshll.u32 %v2461_v45, 16 }
  0xf4   : > { %v1217_v55 = vor.u32 %v1216_v37, %v1212_v48  ;;  %v1234_v61 = vshll.u32 %v3469_v4, 16  ;;  %v1238_v62 = vshrl.u32 %v3469_v4, 16  ;;  %v1244_v2 = vshll.u32 %v3473_v9, 16  ;;  %v3569_v4 = vld [vmem:[%s3198_s21 + $0x38] sm:$0x1] }
  0xf5   : > { %2020 = vrot.lane.b32.xlu2 %v2661_v34, %s2847_s28  ;;  %v1791_v0 = vpack.c.b16 %v1779_v42, %v1778_v47  ;;  %v1213_v60 = vsel %vm3233_vm14, %v1208_v51, %v1212_v48  ;;  %v1509_v57 = vshrl.u32 %v2501_v49, 16  ;;  %v1230_v58 = vrot.slane %v1228_v56, 5  ;;  %v816_v42 = vld [vmem:[%s3198_s21 + $0xc] sm:$0xf] }
  0xf6   : > { %1970 = vrot.lane.b32.xlu0 %v3518_v50, %s2852_s9  ;;  %v1218_v44 = vrot.slane %v1217_v55, 4  ;;  %v1904_v11 = vunpack.c.l.b16 %v1213_v60  ;;  %v1236_v12 = vrot.slane %v1234_v61, 5  ;;  %v1240_v13 = vrot.slane %v1238_v62, 4  ;;  %v817_v61 = vld [vmem:[%s3198_s21 + $0x10] sm:$0xf] }
  0xf7   : > { %v1246_v14 = vrot.slane %v1244_v2, 5  ;;  %v1511_v15 = vrot.slane %v1509_v57, 4  ;;  %v1512_v16 = vshll.u32 %v2501_v49, 16  ;;  %v1231_v17 = vor.u32 %v1230_v58, %v1227_v54  ;;  %v831_v62 = vld [vmem:[%s3198_s21 + $0x14] sm:$0x1] }
  0xf8   : > { %v1223_v9 = vsel %vm3233_vm14, %v1218_v44, %v1222_v53  ;;  %v1518_v19 = vshll.u32 %v3564_v6, 16  ;;  %v1522_v21 = vshrl.u32 %v3564_v6, 16  ;;  %v1241_v22 = vor.u32 %v1240_v13, %v1236_v12  ;;  %v1034_v44 = vld [vmem:[%s3198_s21 + $0xc] sm:$0xe] }
  0xf9   : > { %v1905_v50 = vunpack.c.l.b16 %v1223_v9  ;;  %v1514_v26 = vrot.slane %v1512_v16, 5  ;;  %v1528_v63 = vshll.u32 %v3569_v4, 16  ;;  %v2087_v28 = vpack.c.b16 %v2075_v8, %v2074_v24 }
  0xfa   : > { %1800 = vrot.lane.b32.xlu1 %v1790_v35, %s2849_s6  ;;  %v1232_v30 = vrot.slane %v1231_v17, 4  ;;  %v1520_v45 = vrot.slane %v1518_v19, 5  ;;  %v1524_v31 = vrot.slane %v1522_v21, 4  ;;  %v1242_v5 = vrot.slane %v1241_v22, 4  ;;  %v3588_v35 = vpop.permute.xlu2 %2026 }
  0xfb   : > { %v1918_v32 = vpack.c.b16 %v1905_v50, %v1904_v11  ;;  %v1515_v33 = vor.u32 %v1514_v26, %v1511_v15  ;;  %v1530_v29 = vrot.slane %v1528_v63, 5  ;;  %v1533_v18 = vshrl.u32 %v2503_v59, 16  ;;  %v1035_v63 = vld [vmem:[%s3198_s21 + $0x18] sm:$0xe] }
  0xfc   : > { %v1237_v1 = vsel %vm3233_vm14, %v1232_v30, %v1236_v12  ;;  %v1525_v10 = vor.u32 %v1524_v31, %v1520_v45  ;;  %v1247_v7 = vsel %vm3233_vm14, %v1242_v5, %v1246_v14  ;;  %v1536_v8 = vshll.u32 %v2503_v59, 16 }
  0xfd   : > { %1802 = vrot.lane.b32.xlu2 %v1791_v0, %s2849_s6  ;;  %v1906_v52 = vunpack.c.l.b16 %v1237_v1  ;;  %v1516_v24 = vrot.slane %v1515_v33, 4  ;;  %v1907_v34 = vunpack.c.l.b16 %v1247_v7  ;;  %v1535_v43 = vrot.slane %v1533_v18, 4  ;;  %v2651_v0 = vld [vmem:[%s3198_s21 + $0x24] sm:$0xff] }
  0xfe   : > { %2098 = vrot.lane.b32.xlu0 %v2087_v28, %s2848_s29  ;;  %v1526_v40 = vrot.slane %v1525_v10, 4  ;;  %v1542_v41 = vshll.u32 %v3487_v20, 16  ;;  %v3591_v46 = vpop.permute.xlu1 %1898  ;;  %v1538_v48 = vrot.slane %v1536_v8, 5  ;;  %v1546_v37 = vshrl.u32 %v3487_v20, 16 }
  0xff   : > { %v1521_v47 = vsel %vm3233_vm14, %v1516_v24, %v1520_v45  ;;  %v1552_v49 = vshll.u32 %v3490_v27, 16  ;;  %v1919_v54 = vpack.c.b16 %v1907_v34, %v1906_v52  ;;  %v866_v57 = vshrl.u32 %v816_v42, 16  ;;  %v2659_v24 = vld [vmem:[%s3198_s21 + $0x30] sm:$0xff] }
 0x100   : > { %v1531_v51 = vsel %vm3233_vm14, %v1526_v40, %v1530_v29  ;;  %v1544_v53 = vrot.slane %v1542_v41, 5  ;;  %v1539_v55 = vor.u32 %v1538_v48, %v1535_v43  ;;  %v1548_v56 = vrot.slane %v1546_v37, 4  ;;  %v2457_v37 = vld [vmem:[%s3198_s21 + $0x18] sm:$0xf] }
 0x101   : > { %v2032_v60 = vunpack.c.l.b16 %v1521_v47  ;;  %v2033_v2 = vunpack.c.l.b16 %v1531_v51  ;;  %v1554_v27 = vrot.slane %v1552_v49, 5  ;;  %v869_v58 = vshll.u32 %v816_v42, 16  ;;  %v2458_v49 = vld [vmem:[%s3198_s21 + $0x1c] sm:$0xf] }
 0x102   : > { %1928 = vrot.lane.b32.xlu1 %v1918_v32, %s2850_s7  ;;  %v1540_v20 = vrot.slane %v1539_v55, 4  ;;  %v1549_v11 = vor.u32 %v1548_v56, %v1544_v53  ;;  %v868_v12 = vrot.slane %v866_v57, 4  ;;  %v875_v13 = vshll.u32 %v817_v61, 16  ;;  %v2648_v55 = vld [vmem:[%s3198_s21 + $0x54] sm:$0xff] }
 0x103   : > { %v879_v14 = vshrl.u32 %v817_v61, 16  ;;  %v885_v15 = vshll.u32 %v831_v62, 16  ;;  %v871_v17 = vrot.slane %v869_v58, 5  ;;  %v2446_v19 = vrot.slane %v1034_v44, 9  ;;  %v2480_v57 = vld [vmem:[%s3198_s21 + $0x18] sm:$0xe] }
 0x104   : > { %v1545_v16 = vsel %vm3233_vm14, %v1540_v20, %v1544_v53  ;;  %v1550_v9 = vrot.slane %v1549_v11, 4  ;;  %v2046_v21 = vpack.c.b16 %v2033_v2, %v2032_v60  ;;  %v877_v22 = vrot.slane %v875_v13, 5  ;;  %v3614_v5 = vpop.permute.xlu2 %1978  ;;  %v2647_v11 = vld [vmem:[%s3198_s21 + $0x48] sm:$0xff] }
 0x105   : > { %1930 = vrot.lane.b32.xlu2 %v1919_v54, %s2850_s7  ;;  %v2034_v50 = vunpack.c.l.b16 %v1545_v16  ;;  %v881_v26 = vrot.slane %v879_v14, 4  ;;  %v872_v30 = vor.u32 %v871_v17, %v868_v12  ;;  %v1077_v45 = vrot.slane %v817_v61, 5  ;;  %v2472_v54 = vld [vmem:[%s3198_s21 + $0x20] sm:$0x1] }
 0x106   : > { %1888 = vrot.lane.b32.xlu0 %v2651_v0, %s2845_s24  ;;  %v1555_v28 = vsel %vm3233_vm14, %v1550_v9, %v1554_v27  ;;  %v1080_v31 = vrot.slane %v831_v62, 5  ;;  %v887_v1 = vrot.slane %v885_v15, 5  ;;  %v2447_v52 = vrot.slane %v1035_v63, 9 }
 0x107   : > { %v3610_v59 = vpop.permute.xlu0 %1850  ;;  %v2035_v32 = vunpack.c.l.b16 %v1555_v28  ;;  %v882_v33 = vor.u32 %v881_v26, %v877_v22  ;;  %v873_v29 = vrot.slane %v872_v30, 4  ;;  %v1078_v18 = vsel %vm3204_vm13, %v2446_v19, %v1077_v45  ;;  %v2481_v30 = vld [vmem:[%s3198_s21 + $0x24] sm:$0xe] }
 0x108   : > { %v1079_v7 = vrot.slane %v1077_v45, 4  ;;  %v1814_v40 = vunpack.c.l.b16 %v1078_v18  ;;  %v1084_v43 = vrot.slane %v3497_v25, 5  ;;  %v1087_v48 = vrot.slane %v3507_v39, 5 }
 0x109   : > { %v3616_v10 = vpop.permute.xlu1 %2106  ;;  %v2047_v8 = vpack.c.b16 %v2035_v32, %v2034_v50  ;;  %v883_v34 = vrot.slane %v882_v33, 4  ;;  %v878_v41 = vsel %vm3233_vm14, %v873_v29, %v877_v22  ;;  %v1177_v0 = vshrl.u32 %v2457_v37, 16 }
 0x10a   : > { %2056 = vrot.lane.b32.xlu1 %v2046_v21, %s2851_s8  ;;  %v1081_v47 = vsel %vm3204_vm13, %v1079_v7, %v1080_v31  ;;  %v1774_v51 = vunpack.c.l.b16 %v878_v41  ;;  %v1085_v25 = vsel %vm3204_vm13, %v2447_v52, %v1084_v43  ;;  %v1086_v61 = vrot.slane %v1084_v43, 4 }
 0x10b   : > { %v888_v42 = vsel %vm3233_vm14, %v883_v34, %v887_v1  ;;  %v1815_v53 = vunpack.c.l.b16 %v1081_v47  ;;  %v1816_v39 = vunpack.c.l.b16 %v1085_v25  ;;  %v1180_v60 = vshll.u32 %v2457_v37, 16  ;;  %v2499_v34 = vld [vmem:[%s3198_s21 + $0x24] sm:$0xf]  ;;  %v2500_v25 = vld [vmem:[%s3198_s21 + $0x28] sm:$0xf] }
 0x10c   : > { %v1775_v56 = vunpack.c.l.b16 %v888_v42  ;;  %v1186_v2 = vshll.u32 %v2458_v49, 16  ;;  %v1088_v20 = vsel %vm3204_vm13, %v1086_v61, %v1087_v48  ;;  %v1190_v27 = vshrl.u32 %v2458_v49, 16  ;;  %v2514_v61 = vld [vmem:[%s3198_s21 + $0x2c] sm:$0x1] }
 0x10d   : > { %2058 = vrot.lane.b32.xlu2 %v2047_v8, %s2851_s8  ;;  %v1829_v62 = vpack.c.b16 %v1815_v53, %v1814_v40  ;;  %v1196_v58 = vshll.u32 %v2472_v54, 16  ;;  %v1817_v13 = vunpack.c.l.b16 %v1088_v20  ;;  %v1179_v14 = vrot.slane %v1177_v0, 4 }
 0x10e   : > { %2016 = vrot.lane.b32.xlu0 %v2659_v24, %s2847_s28  ;;  %v1789_v44 = vpack.c.b16 %v1775_v56, %v1774_v51  ;;  %v1182_v15 = vrot.slane %v1180_v60, 5  ;;  %v1188_v16 = vrot.slane %v1186_v2, 5  ;;  %v1192_v17 = vrot.slane %v1190_v27, 4 }
 0x10f   : > { %v1198_v19 = vrot.slane %v1196_v58, 5  ;;  %v2488_v21 = vrot.slane %v2480_v57, 9  ;;  %v1830_v22 = vpack.c.b16 %v1817_v13, %v1816_v39  ;;  %v1385_v28 = vrot.slane %v2458_v49, 5 }
 0x110   : > { %v1811_v12 = vpop.permute.xlu0 %1810  ;;  %v1183_v63 = vor.u32 %v1182_v15, %v1179_v14  ;;  %v1193_v33 = vor.u32 %v1192_v17, %v1188_v16  ;;  %v1388_v1 = vrot.slane %v2472_v54, 5  ;;  %v1395_v49 = vrot.slane %v3540_v38, 5 }
 0x111   : > { %v2132_v9 = vsel %vm2108_vm15, %v2648_v55, %v1811_v12  ;;  %v1386_v18 = vsel %vm3204_vm13, %v2488_v21, %v1385_v28  ;;  %v1387_v7 = vrot.slane %v1385_v28, 4  ;;  %v1485_v54 = vshrl.u32 %v2499_v34, 16  ;;  %v1033_v21 = vld [vmem:[%s3198_s21] sm:$0xe] }
 0x112   : > { %v2149_v50 = vsel %vm2133_vm0, %v2132_v9, %v3610_v59  ;;  %1838 = vrot.lane.b32.xlu1 %v1829_v62, %s2846_s27  ;;  %v1809_v26 = vpop.permute.xlu2 %1808  ;;  %v1184_v59 = vrot.slane %v1183_v63, 4  ;;  %v1194_v24 = vrot.slane %v1193_v33, 4  ;;  %v1942_v8 = vunpack.c.l.b16 %v1386_v18  ;;  %v2522_v62 = vld [vmem:[%s3198_s21 + $0x24] sm:$0xe] }
 0x113   : > { %v1939_v45 = vpop.permute.xlu1 %1938  ;;  %v2166_v31 = vsel %vm2150_vm1, %v2149_v50, %v3591_v46  ;;  %v3650_v32 = vsel %vm2108_vm15, %v2647_v11, %v1809_v26  ;;  %v2489_v46 = vrot.slane %v2481_v30, 9  ;;  %v1389_v41 = vsel %vm3204_vm13, %v1387_v7, %v1388_v1  ;;  %v3693_v18 = vld [vmem:[%s3198_s21 + $0x4] sm:$0xf] }
 0x114   : > { %v2183_v29 = vsel %vm2167_vm2, %v2166_v31, %v1939_v45  ;;  %v1189_v43 = vsel %vm3233_vm14, %v1184_v59, %v1188_v16  ;;  %v1199_v47 = vsel %vm3233_vm14, %v1194_v24, %v1198_v19  ;;  %v1943_v37 = vunpack.c.l.b16 %v1389_v41 }
 0x115   : > { %v2200_v52 = vsel %vm2184_vm3, %v2183_v29, %v3614_v5  ;;  %1840 = vrot.lane.b32.xlu2 %v1830_v22, %s2846_s27  ;;  %v1392_v5 = vrot.slane %v3537_v23, 5  ;;  %v1902_v48 = vunpack.c.l.b16 %v1189_v43  ;;  %v1903_v51 = vunpack.c.l.b16 %v1199_v47 }
 0x116   : > { %1798 = vrot.lane.b32.xlu0 %v1789_v44, %s2849_s6  ;;  %v2217_v40 = vsel %vm2201_vm4, %v2200_v52, %v3588_v35  ;;  %v1957_v56 = vpack.c.b16 %v1943_v37, %v1942_v8  ;;  %v1488_v39 = vshll.u32 %v2499_v34, 16  ;;  %v1487_v2 = vrot.slane %v1485_v54, 4  ;;  %v2479_v34 = vld [vmem:[%s3198_s21 + $0xc] sm:$0xe]  ;;  %v3708_v37 = vld [vmem:[%s3198_s21 + $0x10] sm:$0xf] }
 0x117   : > { %v1393_v35 = vsel %vm3204_vm13, %v2489_v46, %v1392_v5  ;;  %v1394_v53 = vrot.slane %v1392_v5, 4  ;;  %v1917_v38 = vpack.c.b16 %v1903_v51, %v1902_v48  ;;  %v1494_v27 = vshll.u32 %v2500_v25, 16  ;;  %v3702_v46 = vld [vmem:[%s3198_s21 + $0x8] sm:$0x1] }
 0x118   : > { %v2067_v42 = vpop.permute.xlu0 %2066  ;;  %v1944_v23 = vunpack.c.l.b16 %v1393_v35  ;;  %v1490_v11 = vrot.slane %v1488_v39, 5  ;;  %v1498_v58 = vshrl.u32 %v2500_v25, 16  ;;  %v1504_v12 = vshll.u32 %v2514_v61, 16 }
 0x119   : > { %v2234_v55 = vsel %vm2218_vm5, %v2217_v40, %v2067_v42  ;;  %v1396_v60 = vsel %vm3204_vm13, %v1394_v53, %v1395_v49  ;;  %v2530_v13 = vrot.slane %v2522_v62, 9  ;;  %v1693_v14 = vrot.slane %v2500_v25, 5 }
 0x11a   : > { %v2251_v0 = vsel %vm2235_vm6, %v2234_v55, %v3616_v10  ;;  %1966 = vrot.lane.b32.xlu1 %v1957_v56, %s2852_s9  ;;  %v1945_v44 = vunpack.c.l.b16 %v1396_v60  ;;  %v2523_v10 = vld [vmem:[%s3198_s21 + $0x30] sm:$0xe]  ;;  %v1491_v9 = vor.u32 %v1490_v11, %v1487_v2  ;;  %v1496_v17 = vrot.slane %v1494_v27, 5  ;;  %v3719_v56 = vld [vmem:[%s3198_s21 + $0x1c] sm:$0xf] }
 0x11b   : > { %v2277_v57 = vsel %vm2259_vm7, %v2251_v0, 0  ;;  %v1897_v20 = vpop.permute.xlu1 %1896  ;;  %v1696_v19 = vrot.slane %v2514_v61, 5  ;;  %v1500_v50 = vrot.slane %v1498_v58, 4  ;;  %v1506_v22 = vrot.slane %v1504_v12, 5  ;;  %v814_v60 = vld [vmem:[%s3198_s21] sm:$0xf] }
 0x11c   : > { %2279 = vmatpush.bf16.xpose.msra.mxu0 %v2277_v57  ;;  %v1958_v15 = vpack.c.b16 %v1945_v44, %v1944_v23  ;;  %v1694_v26 = vsel %vm3204_vm13, %v2530_v13, %v1693_v14  ;;  %v1695_v63 = vrot.slane %v1693_v14, 4  ;;  %v1492_v28 = vrot.slane %v1491_v9, 4  ;;  %v3722_v23 = vld [vmem:[%s3198_s21 + $0x14] sm:$0x1]  ;;  %v3732_v11 = vld [vmem:[%s3198_s21 + $0x20] sm:$0x1] }
 0x11d   : > { %v1937_v16 = vpop.permute.xlu2 %1936  ;;  %v2070_v30 = vunpack.c.l.b16 %v1694_v26  ;;  %v2531_v45 = vrot.slane %v2523_v10, 9  ;;  %v1700_v31 = vrot.slane %v3564_v6, 5  ;;  %v1501_v1 = vor.u32 %v1500_v50, %v1496_v17  ;;  %v2521_v27 = vld [vmem:[%s3198_s21 + $0x18] sm:$0xe]  ;;  %v2649_v14 = vld [vmem:[%s3198_s21 + $0xc] sm:$0xff] }
 0x11e   : > { %1926 = vrot.lane.b32.xlu0 %v1917_v38, %s2850_s7  ;;  %1968 = vrot.lane.b32.xlu2 %v1958_v15, %s2852_s9  ;;  %v1697_v29 = vsel %vm3204_vm13, %v1695_v63, %v1696_v19  ;;  %v1703_v59 = vrot.slane %v3569_v4, 5  ;;  %v2445_v7 = vrot.slane %v1033_v21, 9  ;;  %v1497_v24 = vsel %vm3233_vm14, %v1492_v28, %v1496_v17  ;;  %v2455_v50 = vld [vmem:[%s3198_s21 + $0xc] sm:$0xf] }
 0x11f   : > { %v2071_v8 = vunpack.c.l.b16 %v1697_v29  ;;  %v1701_v6 = vsel %vm3204_vm13, %v2531_v45, %v1700_v31  ;;  %v1502_v4 = vrot.slane %v1501_v1, 4  ;;  %v1702_v43 = vrot.slane %v1700_v31, 4  ;;  %v2650_v45 = vld [vmem:[%s3198_s21 + $0x18] sm:$0xff] }
 0x120   : > { %v1849_v33 = vpop.permute.xlu0 %1848  ;;  %v2030_v41 = vunpack.c.l.b16 %v1497_v24  ;;  %v2072_v47 = vunpack.c.l.b16 %v1701_v6  ;;  %v1070_v48 = vrot.slane %v3693_v18, 5  ;;  %v1073_v51 = vrot.slane %v3702_v46, 5 }
 0x121   : > { %v2147_v52 = vsel %vm2133_vm0, %v3650_v32, %v1849_v33  ;;  %v2085_v5 = vpack.c.b16 %v2071_v8, %v2070_v30  ;;  %v1507_v49 = vsel %vm3233_vm14, %v1502_v4, %v1506_v22  ;;  %v1704_v42 = vsel %vm3204_vm13, %v1702_v43, %v1703_v59  ;;  %v2646_v43 = vld [vmem:[%s3198_s21 + $0x3c] sm:$0xff] }
 0x122   : > { %v2164_v40 = vsel %vm2150_vm1, %v2147_v52, %v1897_v20  ;;  %v2487_v35 = vrot.slane %v2479_v34, 9  ;;  %v2031_v53 = vunpack.c.l.b16 %v1507_v49  ;;  %v2073_v25 = vunpack.c.l.b16 %v1704_v42 }
 0x123   : > { %v2025_v32 = vpop.permute.xlu1 %2024  ;;  %2094 = vrot.lane.b32.xlu1 %v2085_v5, %s2848_s29  ;;  %v1071_v54 = vsel %vm3204_vm13, %v2445_v7, %v1070_v48  ;;  %v1072_v55 = vrot.slane %v1070_v48, 4  ;;  %v1378_v61 = vrot.slane %v3708_v37, 5  ;;  %v2181_v2 = vsel %vm2167_vm2, %v2164_v40, %v1937_v16 }
 0x124   : > { %v2045_v39 = vpack.c.b16 %v2031_v53, %v2030_v41  ;;  %v2086_v62 = vpack.c.b16 %v2073_v25, %v2072_v47  ;;  %v1812_v44 = vunpack.c.l.b16 %v1071_v54  ;;  %v1686_v58 = vrot.slane %v3719_v56, 5  ;;  %v2497_v54 = vld [vmem:[%s3198_s21 + $0x18] sm:$0xf] }
 0x125   : > { %v1074_v38 = vsel %vm3204_vm13, %v1072_v55, %v1073_v51  ;;  %v1379_v20 = vsel %vm3204_vm13, %v2487_v35, %v1378_v61  ;;  %v1380_v10 = vrot.slane %v1378_v61, 4  ;;  %v1381_v15 = vrot.slane %v3722_v23, 5 }
 0x126   : > { %2054 = vrot.lane.b32.xlu0 %v2045_v39, %s2851_s8  ;;  %2096 = vrot.lane.b32.xlu2 %v2086_v62, %s2848_s29  ;;  %v1813_v13 = vunpack.c.l.b16 %v1074_v38  ;;  %v1940_v9 = vunpack.c.l.b16 %v1379_v20  ;;  %v2529_v17 = vrot.slane %v2521_v27, 9  ;;  %v1689_v19 = vrot.slane %v3732_v11, 5 }
 0x127   : > { %v2065_v0 = vpop.permute.xlu2 %2064  ;;  %v842_v21 = vshrl.u32 %v814_v60, 16  ;;  %v1688_v26 = vrot.slane %v1686_v58, 4  ;;  %v845_v63 = vshll.u32 %v814_v60, 16  ;;  %v851_v28 = vshll.u32 %v3693_v18, 16  ;;  %v2658_v60 = vld [vmem:[%s3198_s21 + $0x24] sm:$0xff] }
 0x128   : > { %v1977_v57 = vpop.permute.xlu0 %1976  ;;  %v1828_v30 = vpack.c.b16 %v1813_v13, %v1812_v44  ;;  %v1382_v31 = vsel %vm3204_vm13, %v1380_v10, %v1381_v15  ;;  %v855_v1 = vshrl.u32 %v3693_v18, 16  ;;  %v861_v7 = vshll.u32 %v3702_v46, 16 }
 0x129   : > { %v2198_v12 = vsel %vm2184_vm3, %v2181_v2, %v1977_v57  ;;  %v844_v33 = vrot.slane %v842_v21, 4  ;;  %v847_v29 = vrot.slane %v845_v63, 5  ;;  %v853_v59 = vrot.slane %v851_v28, 5 }
 0x12a   : > { %v2215_v22 = vsel %vm2201_vm4, %v2198_v12, %v2025_v32  ;;  %v1153_v52 = vshrl.u32 %v2455_v50, 16  ;;  %v857_v6 = vrot.slane %v855_v1, 4  ;;  %v1156_v34 = vshll.u32 %v2455_v50, 16  ;;  %v2657_v32 = vld [vmem:[%s3198_s21 + $0x18] sm:$0xff] }
 0x12b   : > { %v1807_v16 = vpop.permute.xlu1 %1806  ;;  %1884 = vrot.lane.b32.xlu1 %v2649_v14, %s2845_s24  ;;  %v2232_v24 = vsel %vm2218_vm5, %v2215_v22, %v2065_v0  ;;  %v1162_v40 = vshll.u32 %v3708_v37, 16  ;;  %v1941_v41 = vunpack.c.l.b16 %v1382_v31  ;;  %v848_v5 = vor.u32 %v847_v29, %v844_v33 }
 0x12c   : > { %v1155_v47 = vrot.slane %v1153_v52, 4  ;;  %v1166_v18 = vshrl.u32 %v3708_v37, 16  ;;  %v858_v48 = vor.u32 %v857_v6, %v853_v59  ;;  %v1158_v49 = vrot.slane %v1156_v34, 5 }
 0x12d   : > { %v1164_v42 = vrot.slane %v1162_v40, 5  ;;  %v849_v35 = vrot.slane %v848_v5, 4  ;;  %v863_v53 = vrot.slane %v861_v7, 5  ;;  %v1687_v37 = vsel %vm3204_vm13, %v2529_v17, %v1686_v58 }
 0x12e   : > { %1836 = vrot.lane.b32.xlu0 %v1828_v30, %s2846_s27  ;;  %1886 = vrot.lane.b32.xlu2 %v2650_v45, %s2845_s24  ;;  %v1168_v25 = vrot.slane %v1166_v18, 4  ;;  %v859_v61 = vrot.slane %v858_v48, 4  ;;  %v2126_v39 = vsel %vm2108_vm15, %v2646_v43, %v1807_v16  ;;  %v1956_v62 = vpack.c.b16 %v1941_v41, %v1940_v9  ;;  %s2635_s27 = sshll.u32 %s2830_s16, 1  ;;  %s2295_s16 = scalar_lea.sflag [#allocation4], %s210_s4 }
 0x12f   : > { %v1847_v8 = vpop.permute.xlu2 %1846  ;;  %v1690_v0 = vsel %vm3204_vm13, %v1688_v26, %v1689_v19  ;;  %v1172_v38 = vshll.u32 %v3722_v23, 16  ;;  %v854_v2 = vsel %vm3233_vm14, %v849_v35, %v853_v59  ;;  %v1159_v57 = vor.u32 %v1158_v49, %v1155_v47  ;;  %v2645_v49 = vld [vmem:[%s3198_s21 + $0x30] sm:$0xff] }
 0x130   : > { %v2105_v4 = vpop.permute.xlu0 %2104  ;;  %v1169_v44 = vor.u32 %v1168_v25, %v1164_v42  ;;  %v1461_v20 = vshrl.u32 %v2497_v54, 16  ;;  %v864_v27 = vsel %vm3233_vm14, %v859_v61, %v863_v53  ;;  %v1464_v58 = vshll.u32 %v2497_v54, 16 }
 0x131   : > { %v2249_v46 = vsel %vm2235_vm6, %v2232_v24, %v2105_v4  ;;  %v1470_v12 = vshll.u32 %v3719_v56, 16  ;;  %v2145_v36 = vsel %vm2133_vm0, %v2126_v39, %v1847_v8  ;;  %v1474_v23 = vshrl.u32 %v3719_v56, 16 }
 0x132   : > { %v2275_v51 = vsel %vm2259_vm7, %v2249_v46, 0  ;;  %v2068_v10 = vunpack.c.l.b16 %v1687_v37  ;;  %v2069_v15 = vunpack.c.l.b16 %v1690_v0  ;;  %v1772_v16 = vunpack.c.l.b16 %v854_v2 }
 0x133   : > { %2280 = vmatpush.bf16.xpose.msra.mxu0 %v2275_v51  ;;  %v1935_v55 = vpop.permute.xlu1 %1934  ;;  %2012 = vrot.lane.b32.xlu1 %v2657_v32, %s2847_s28  ;;  %v1174_v9 = vrot.slane %v1172_v38, 5  ;;  %v1773_v17 = vunpack.c.l.b16 %v864_v27  ;;  %v1160_v19 = vrot.slane %v1159_v57, 4  ;;  %v1170_v21 = vrot.slane %v1169_v44, 4 }
 0x134   : > { %v1463_v50 = vrot.slane %v1461_v20, 4  ;;  %v1466_v26 = vrot.slane %v1464_v58, 5  ;;  %v1472_v63 = vrot.slane %v1470_v12, 5  ;;  %v1476_v28 = vrot.slane %v1474_v23, 4  ;;  %v2644_v58 = vld [vmem:[%s3198_s21 + $0x24] sm:$0xff] }
 0x135   : > { %v2084_v45 = vpack.c.b16 %v2069_v15, %v2068_v10  ;;  %v1788_v31 = vpack.c.b16 %v1773_v17, %v1772_v16  ;;  %v1165_v33 = vsel %vm3233_vm14, %v1160_v19, %v1164_v42  ;;  %v1175_v1 = vsel %vm3233_vm14, %v1170_v21, %v1174_v9 }
 0x136   : > { %1964 = vrot.lane.b32.xlu0 %v1956_v62, %s2852_s9  ;;  %2014 = vrot.lane.b32.xlu2 %v2658_v60, %s2847_s28  ;;  %v1467_v29 = vor.u32 %v1466_v26, %v1463_v50  ;;  %v1477_v59 = vor.u32 %v1476_v28, %v1472_v63  ;;  %v1480_v7 = vshll.u32 %v3732_v11, 16  ;;  %v1900_v34 = vunpack.c.l.b16 %v1165_v33  ;;  %v2643_v28 = vld [vmem:[%s3198_s21 + $0x18] sm:$0xff]  ;;  %s2307_s28 = sadd.s32 %s2826_s15, %s2635_s27  ;;  %s2311_s9 = sshll.u32 %s212_s11, 4  ;;  %s2312_s9 = int_to_ptr.vmem [resolvable:$true] %s2311_s9 }
 0x137   : > { %v1975_v13 = vpop.permute.xlu2 %1974  ;;  %v1901_v40 = vunpack.c.l.b16 %v1175_v1  ;;  %s2768_s27 = scalar_lea.hbm %s3907_s3, 16 }
 0x138   : > { %v1895_v14 = vpop.permute.xlu0 %1894  ;;  %v1468_v43 = vrot.slane %v1467_v29, 4  ;;  %v1478_v41 = vrot.slane %v1477_v59, 4  ;;  %v1482_v5 = vrot.slane %v1480_v7, 5 }
 0x139   : > { %v2162_v22 = vsel %vm2150_vm1, %v2145_v36, %v1895_v14  ;;  %v1916_v46 = vpack.c.b16 %v1901_v40, %v1900_v34 }
 0x13a   : > { %v2179_v56 = vsel %vm2167_vm2, %v2162_v22, %v1935_v55  ;;  %v1473_v32 = vsel %vm3233_vm14, %v1468_v43, %v1472_v63  ;;  %v1483_v48 = vsel %vm3233_vm14, %v1478_v41, %v1482_v5 }
 0x13b   : > { %v2063_v30 = vpop.permute.xlu1 %2062  ;;  %v2196_v24 = vsel %vm2184_vm3, %v2179_v56, %v1975_v13  ;;  %v2028_v35 = vunpack.c.l.b16 %v1473_v32  ;;  %v2029_v53 = vunpack.c.l.b16 %v1483_v48 }
 0x13d   : > { %v2044_v55 = vpack.c.b16 %v2029_v53, %v2028_v35 }
 0x13e   : > { %2092 = vrot.lane.b32.xlu0 %v2084_v45, %s2848_s29  ;;  %1796 = vrot.lane.b32.xlu2 %v1788_v31, %s2849_s6  ;;  %s2636_s29 = sshll.u32 %s2307_s28, 2 }
 0x13f   : > { %v2103_v52 = vpop.permute.xlu2 %2102 }
 0x140   : > { %v2023_v8 = vpop.permute.xlu0 %2022 }
 0x141   : > { %v2213_v6 = vsel %vm2201_vm4, %v2196_v24, %v2023_v8 }
 0x142   : > { %v2230_v4 = vsel %vm2218_vm5, %v2213_v6, %v2063_v30 }
 0x143   : > { %v2247_v11 = vsel %vm2235_vm6, %v2230_v4, %v2103_v52  ;;  %v1845_v47 = vpop.permute.xlu1 %1844 }
 0x144   : > { %v2273_v18 = vsel %vm2259_vm7, %v2247_v11, 0  ;;  %v2642_v11 = vld [vmem:[%s3198_s21 + $0xc] sm:$0xff] }
 0x145   : > { %2281 = vmatpush.bf16.xpose.msra.mxu0 %v2273_v18 }
 0x146   : > { %1924 = vrot.lane.b32.xlu2 %v1916_v46, %s2850_s7 }
 0x147   : > { %v1893_v42 = vpop.permute.xlu2 %1892 }
 0x148   : > { %v1805_v51 = vpop.permute.xlu0 %1804 }
 0x149   : > { %v2123_v25 = vsel %vm2108_vm15, %v2645_v49, %v1805_v51 }
 0x14a   : > { %v2143_v37 = vsel %vm2133_vm0, %v2123_v25, %v1845_v47 }
 0x14b   : > { %v1973_v54 = vpop.permute.xlu1 %1972  ;;  %v2160_v62 = vsel %vm2150_vm1, %v2143_v37, %v1893_v42 }
 0x14e   : > { %2052 = vrot.lane.b32.xlu2 %v2044_v55, %s2851_s8  ;;  %s2309_s8 = scalar_lea.hbm %s3907_s3, %s2636_s29 }
 0x14f   : > { %v2021_v61 = vpop.permute.xlu2 %2020  ;;  %s2313_s10 = sshll.u32 %s2309_s8, 4  ;;  %s2314_s10 = int_to_ptr.hbm [resolvable:$true] %s2313_s10 }
 0x150   : > { %v1933_v39 = vpop.permute.xlu0 %1932  ;;  %s2762_s15 = sshra.s32 %s2314_s10, 4  ;;  %s2763_s15 = int_to_ptr.hbm [resolvable:$true] %s2762_s15 }
 0x151   : > { %v2177_v3 = vsel %vm2167_vm2, %v2160_v62, %v1933_v39  ;;  %v2253_v39 = vld [vmem:[%s3906_s2] sm:$0xf]  ;;  %s2764_s20 = scalar_lea.hbm %s2763_s15, 4  ;;  %p2769_p4 = scmp.lt.s32.totalorder %s2763_s15, %s3907_s3 }
 0x152   : > { %v2194_v38 = vsel %vm2184_vm3, %v2177_v3, %v1973_v54  ;;  %v2853_v3 = vmov 0   ;;  %p2765_p0 = scmp.ne.s32.totalorder %s2763_s15, %s2764_s20  ;;  %p2770_p5 = scmp.lt.s32.totalorder %s2768_s27, %s2764_s20 }
 0x153   : > { %v2211_v2 = vsel %vm2201_vm4, %v2194_v38, %v2021_v61  ;;  %2746 = vset.pattern.permute.xlu1 %v2853_v3  ;;  %2747 = vset.pattern.permute.xlu0 %v2853_v3 }
 0x154   : > { %v2101_v0 = vpop.permute.xlu1 %2100  ;;  %2256 = vperm.xlu1 %2746, %v2253_v39   ;;  %p2766_p1 = pnand %p2765_p0, %p2925_p3  ;;  %p2771_p6 = por %p2770_p5, %p2769_p4 }
 0x156   : > { %p2767_p2 = pneg %p2766_p1 }
 0x157   : > { %v1803_v60 = vpop.permute.xlu2 %1802 }
 0x158   : > { %v2061_v57 = vpop.permute.xlu0 %2060  ;;  %v2120_v13 = vsel %vm2108_vm15, %v2644_v58, %v1803_v60  ;;  %p2772_p7 = pnand %p2771_p6, %p2767_p2 }
 0x159   : > { %v2228_v44 = vsel %vm2218_vm5, %v2211_v2, %v2061_v57 }
 0x15a   : > { %v2245_v20 = vsel %vm2235_vm6, %v2228_v44, %v2101_v0  ;;  %v2641_v0 = vld [vmem:[%s3198_s21] sm:$0xff] }
 0x15b   : > { %v2271_v27 = vsel %vm2259_vm7, %v2245_v20, 0 }
 0x15c   : > { %2282 = vmatpush.bf16.xpose.msra.mxu0 %v2271_v27  ;;  %v1891_v12 = vpop.permute.xlu1 %1890 }
 0x15f   : > { %v1931_v36 = vpop.permute.xlu2 %1930 }
 0x160   : > { %v1843_v23 = vpop.permute.xlu0 %1842 }
 0x161   : > { %v2141_v14 = vsel %vm2133_vm0, %v2120_v13, %v1843_v23 }
 0x162   : > { %v2158_v15 = vsel %vm2150_vm1, %v2141_v14, %v1891_v12 }
 0x163   : > { %v2175_v17 = vsel %vm2167_vm2, %v2158_v15, %v1931_v36 }
 0x164   : > { %v2019_v10 = vpop.permute.xlu1 %2018 }
 0x167   : > { %v2059_v16 = vpop.permute.xlu2 %2058 }
 0x168   : > { %v1971_v9 = vpop.permute.xlu0 %1970 }
 0x169   : > { %v2192_v19 = vsel %vm2184_vm3, %v2175_v17, %v1971_v9  ;;  %v2252_v9 = vld [vmem:[%s3905_s1] sm:$0x3] }
 0x16a   : > { %v2209_v50 = vsel %vm2201_vm4, %v2192_v19, %v2019_v10 }
 0x16b   : > { %v2226_v26 = vsel %vm2218_vm5, %v2209_v50, %v2059_v16 }
 0x16c   : > { %v1801_v21 = vpop.permute.xlu1 %1800 }
 0x16d   : > { %v2117_v45 = vsel %vm2108_vm15, %v2643_v28, %v1801_v21 }
 0x16f   : > { %v1841_v22 = vpop.permute.xlu2 %1840 }
 0x170   : > { %v2099_v63 = vpop.permute.xlu0 %2098  ;;  %v2139_v33 = vsel %vm2133_vm0, %v2117_v45, %v1841_v22 }
 0x171   : > { %v2243_v30 = vsel %vm2235_vm6, %v2226_v26, %v2099_v63 }
 0x172   : > { %v2269_v56 = vsel %vm2259_vm7, %v2243_v30, 0 }
 0x173   : > { %2283 = vmatpush.bf16.xpose.msra.mxu0 %v2269_v56 }
 0x174   : > { %v1929_v31 = vpop.permute.xlu1 %1928 }
 0x178   : > { %v1889_v1 = vpop.permute.xlu0 %1888  ;;  %v1969_v29 = vpop.permute.xlu2 %1968 }
 0x179   : > { %v2156_v59 = vsel %vm2150_vm1, %v2139_v33, %v1889_v1 }
 0x17a   : > { %v2173_v52 = vsel %vm2167_vm2, %v2156_v59, %v1929_v31 }
 0x17b   : > { %v2190_v24 = vsel %vm2184_vm3, %v2173_v52, %v1969_v29 }
 0x17c   : > { %v2057_v7 = vpop.permute.xlu1 %2056 }
 0x180   : > { %v2017_v8 = vpop.permute.xlu0 %2016  ;;  %v2097_v40 = vpop.permute.xlu2 %2096 }
 0x181   : > { %v2207_v6 = vsel %vm2201_vm4, %v2190_v24, %v2017_v8 }
 0x182   : > { %v2224_v34 = vsel %vm2218_vm5, %v2207_v6, %v2057_v7 }
 0x183   : > { %v2241_v4 = vsel %vm2235_vm6, %v2224_v34, %v2097_v40 }
 0x184   : > { %v2267_v43 = vsel %vm2259_vm7, %v2241_v4, 0  ;;  %v1839_v41 = vpop.permute.xlu1 %1838 }
 0x185   : > { %2284 = vmatpush.bf16.xpose.msra.mxu0 %v2267_v43 }
 0x188   : > { %v1799_v5 = vpop.permute.xlu0 %1798  ;;  %v1887_v47 = vpop.permute.xlu2 %1886 }
 0x189   : > { %v2114_v18 = vsel %vm2108_vm15, %v2642_v11, %v1799_v5 }
 0x18a   : > { %v2137_v32 = vsel %vm2133_vm0, %v2114_v18, %v1839_v41 }
 0x18b   : > { %v2154_v42 = vsel %vm2150_vm1, %v2137_v32, %v1887_v47 }
 0x18c   : > { %v1967_v46 = vpop.permute.xlu1 %1966 }
 0x190   : > { %v1927_v48 = vpop.permute.xlu0 %1926  ;;  %v2015_v49 = vpop.permute.xlu2 %2014 }
 0x191   : > { %v2171_v51 = vsel %vm2167_vm2, %v2154_v42, %v1927_v48 }
 0x192   : > { %v2188_v35 = vsel %vm2184_vm3, %v2171_v51, %v1967_v46 }
 0x193   : > { %v2205_v25 = vsel %vm2201_vm4, %v2188_v35, %v2015_v49 }
 0x195   : > { %v2095_v53 = vpop.permute.xlu1 %2094 }
 0x198   : > { %v2055_v54 = vpop.permute.xlu0 %2054  ;;  %v1797_v37 = vpop.permute.xlu2 %1796 }
 0x199   : > { %v2222_v55 = vsel %vm2218_vm5, %v2205_v25, %v2055_v54  ;;  %v2111_v38 = vsel %vm2108_vm15, %v2641_v0, %v1797_v37 }
 0x19a   : > { %v2239_v61 = vsel %vm2235_vm6, %v2222_v55, %v2095_v53 }
 0x19b   : > { %v2265_v62 = vsel %vm2259_vm7, %v2239_v61, 0 }
 0x19c   : > { %2285 = vmatpush.bf16.xpose.msra.mxu0 %v2265_v62 }
 0x19d   : > { %v1885_v2 = vpop.permute.xlu1 %1884 }
 0x1a0   : > { %v1837_v60 = vpop.permute.xlu0 %1836  ;;  %v1925_v44 = vpop.permute.xlu2 %1924 }
 0x1a1   : > { %v2135_v57 = vsel %vm2133_vm0, %v2111_v38, %v1837_v60 }
 0x1a2   : > { %v2152_v20 = vsel %vm2150_vm1, %v2135_v57, %v1885_v2 }
 0x1a3   : > { %v2169_v58 = vsel %vm2167_vm2, %v2152_v20, %v1925_v44 }
 0x1a5   : > { %v2013_v36 = vpop.permute.xlu1 %2012 }
 0x1a8   : > { %v1965_v27 = vpop.permute.xlu0 %1964  ;;  %v2053_v23 = vpop.permute.xlu2 %2052 }
 0x1a9   : > { %v2186_v12 = vsel %vm2184_vm3, %v2169_v58, %v1965_v27 }
 0x1aa   : > { %v2203_v13 = vsel %vm2201_vm4, %v2186_v12, %v2013_v36 }
 0x1ab   : > { %v2220_v14 = vsel %vm2218_vm5, %v2203_v13, %v2053_v23 }
 0x1b0   : > { %v2093_v10 = vpop.permute.xlu0 %2092 }
 0x1b1   : > { %v2237_v15 = vsel %vm2235_vm6, %v2220_v14, %v2093_v10 }
 0x1b2   : > { %v2263_v16 = vsel %vm2259_vm7, %v2237_v15, 0 }
 0x1b3   : > { %2286 = vmatpush.bf16.xpose.msra.mxu0 %v2263_v16 }
 0x1ba   : > { %2633 = vmatmul.msk.bf16.vlgmr.msra.gmra.mxu0 %vm2259_vm7, %v2252_v9 }
 0x1c6   : > { %v2257_v17 = vpop.permute.xlu1 %2256 }
 0x237   : > { %v2288_v19 = vpop.f32.mrf.mxu0 }
 0x238   : > { %v2289_v21 = vadd.f32 %v2288_v19, %v2257_v17 }
 0x23a   : > { %v2292_v50 = vmax.f32 %v2289_v21, 0.0 }
 0x23c   : > { %2293 = vst [vmem:[%s212_s11] sm:$0xf] %v2292_v50 }
 0x23d   : > { %2775 = shalt.err (!%p2772_p7)
}
 0x23e   : > { %2665 = dma.vmem_to_hbm [thread:$0]  (%p2925_p3), %s2312_s9, 64, %s2314_s10, %s2295_s16  }
 0x23f   : > { %v2290_v22 = vpop.f32.mrf.mxu0 }
 0x240 PF: > { %p2671_p9 = scmp.ge.s32.totalorder %s2842_s19, 2  ;;  %s2325_s4 = sand.u32 1, %s2814_s12  }
 0x241   : > { %s2326_s5 = scalar_lea.sflag [#allocation4], %s2325_s4 }
 0x242   : > { %p2668_p10 = pnand %p2671_p9, %p2934_p8 }
 0x244   : > { %p2669_p11 = pneg %p2668_p10 }
 0x246   : > { %2809 = dma.done.wait (%p2669_p11), %s2326_s5, 64  }
 0x247   : > { %2811 = vsyncadd (%p2669_p11), %s2326_s5, 4294967232  ;;  %s16_s19 = sadd.s32 1, %s2842_s19   ;;  %s3922_s12 = smov %s2818_s13 }
 0x248   : > { %p13_p12 = scmp.ge.s32.totalorder %s16_s19, 6   ;;  %s3923_s13 = smov %s2822_s14 }
 0x249   : > { %s3924_s14 = smov %s2943_s30  ;;  %s3925_s15 = smov %s2834_s17 }
 0x24a   : > { %s3926_s16 = smov %s2838_s18  ;;  %s3927_s17 = smov %s3930_s22 }
 0x24b   : > { %s3928_s18 = smov %s3934_s23  ;;  %15 = sbr.rel (!%p13_p12) target bundleno = 5 (0x5), region = 82 }
 0x250   :  { %2332 = vsyncpa [#allocation4], 1 }
 0x251   :  { %2334 = vsyncpa [#allocation4 + $0x1], 1 }

</bundles_post_ra>
